<compile_context>
chip_gen: v6e
topology: v6e:2x2x1
jax: 0.10.0
libtpu: 0.0.40
codegen_flags: <defaults>
</compile_context>

<pallas_src>
import math

import numpy as np
import jax
import jax.numpy as jnp
from jax.experimental import pallas as pl
from jax.experimental.pallas import tpu as pltpu

# ---------------- synthetic "example / graph" configuration ----------------
H = 128                      # conf.hidden_size
NS = 3                       # number of supporting documents
LS = 16                      # support sequence length
LQ = 8                       # query sequence length
NC = 4                       # number of candidates
LC = 8                       # candidate sequence length
# entity spans: (support_idx, token_start, token_end)
ENT_SPANS = [(0, 0, 4), (0, 6, 10), (1, 2, 5), (2, 0, 8), (2, 10, 16)]
NE = len(ENT_SPANS)
N_NODES = NS + NE + NC       # node order: supports, entities, candidates
CAND_TO_ENTS = {0: [0, 2], 1: [1], 2: [], 3: [3, 4]}   # "similar(cand, ent)" links
ANSWER_ID = 1                # example.candidates.index(example.answer)

TS = NS * LS                 # 48 flattened support tokens
TC = NC * LC                 # 32 flattened candidate tokens
N_PAD = 16                   # node rows padded to a sublane multiple
ENT_BASE = NS
CAND_BASE = NS + NE
NEG = -1e30

# TODO(synk): the string embedder / text graph construction / GRU contextualiser
# (and the BiGRU inside Coattention) have no Pallas equivalent; inputs here are
# dense embeddings, the coattention encoder is a dense projection + ReLU, and the
# HDE graph is a deterministic static graph built in-script.


# ----------------------- static graph / mask constants ----------------------
def _build_constants():
    """One [7*16, 128] f32 slab:
       rows  0:16  supp pooling mask (node-row indexed, lanes 0:TS)
       rows 16:32  entity pooling mask (lanes 0:TS)
       rows 32:48  candidate pooling mask (lanes 0:TC)
       rows 48:64  row-normalised adjacency (lanes 0:16)
       rows 64:80  candidate-select matrix  sel[node, c]
       rows 80:96  additive link bias (0 if entity node linked to cand c, else -1e30)
       rows 96:112 misc: row 0 = no-link row (-1e30 if cand c has links, else 0)
    """
    def blk():
        return np.zeros((N_PAD, H), np.float32)

    supp = blk()
    for s in range(NS):
        supp[s, s * LS:(s + 1) * LS] = 1.0
    ent = blk()
    for e, (s, a, b) in enumerate(ENT_SPANS):
        ent[ENT_BASE + e, s * LS + a: s * LS + b] = 1.0
    cand = blk()
    for c in range(NC):
        cand[CAND_BASE + c, c * LC:(c + 1) * LC] = 1.0

    # HDE adjacency (row-normalised), embedded into padded 16x16
    adj = np.zeros((N_NODES, N_NODES), np.float32)

    def connect(a, b):
        adj[a, b] = 1.0
        adj[b, a] = 1.0

    for e, (s, _, _) in enumerate(ENT_SPANS):               # support <-> contained entity
        connect(s, ENT_BASE + e)
    for e1, (s1, _, _) in enumerate(ENT_SPANS):             # entities in same support
        for e2, (s2, _, _) in enumerate(ENT_SPANS):
            if e1 < e2 and s1 == s2:
                connect(ENT_BASE + e1, ENT_BASE + e2)
    for c, ents in CAND_TO_ENTS.items():                    # candidate <-> linked entities
        for e in ents:
            connect(CAND_BASE + c, ENT_BASE + e)
    for a in range(NS):                                     # complete graph among supports
        for b in range(a + 1, NS):
            connect(a, b)
    for a in range(NC):                                     # complete graph among candidates
        for b in range(a + 1, NC):
            connect(CAND_BASE + a, CAND_BASE + b)
    adj += np.eye(N_NODES, dtype=np.float32)                # self loops
    adj /= adj.sum(axis=1, keepdims=True)                   # mean aggregation
    adj_blk = blk()
    adj_blk[:N_NODES, :N_NODES] = adj

    sel = blk()
    for c in range(NC):
        sel[CAND_BASE + c, c] = 1.0

    link_bias = np.full((N_PAD, H), NEG, np.float32)
    for c, ents in CAND_TO_ENTS.items():
        for e in ents:
            link_bias[ENT_BASE + e, c] = 0.0

    misc = blk()
    for c in range(NC):
        if len(CAND_TO_ENTS.get(c, [])) > 0:
            misc[0, c] = NEG          # candidate has links -> disable the 0 fallback

    slab = np.concatenate([supp, ent, cand, adj_blk, sel, link_bias, misc], axis=0)
    return jnp.asarray(slab)          # [112, 128]


CONSTS = _build_constants()


# ------------------------------- fused kernel --------------------------------
def _hde_fused_kernel(s_ref, q_ref, c_ref, consts_ref, w_ref, rv_ref, out_ref):
    f32 = jnp.float32
    s = s_ref[0]                                               # [TS, H]
    q = q_ref[0]                                               # [LQ, H]
    cemb = c_ref[0]                                            # [TC, H]
    rv = rv_ref[...]                                           # [16, H] bias/row-vector slab

    # 1) coattention: affinity -> softmax over query -> attend -> project + ReLU.
    aff = jax.lax.dot_general(s, q, (((1,), (1,)), ((), ())),
                              preferred_element_type=f32)      # [TS, LQ]
    aff = aff - jnp.max(aff, axis=-1, keepdims=True)
    ea = jnp.exp(aff)
    attn = ea * pl.reciprocal(jnp.sum(ea, axis=-1, keepdims=True), approx=True)
    c2q = jnp.dot(attn, q, preferred_element_type=f32)         # [TS, H]
    # merged K=256 matmul: concat([s, c2q]) @ [co_ws; co_wc]
    qa = jnp.maximum(
        jnp.dot(jnp.concatenate([s, c2q], axis=-1), w_ref[0:2 * H, :],
                preferred_element_type=f32) + rv[0:1, :], 0.0)  # [TS, H]

    # 2) summariser: masked self-attentive pooling directly onto 16 node rows.
    def pool(sc_row, mask, x):
        # sc_row [1, T], mask [16, T] (0/1), x [T, H]; per-group-max-stable softmax
        msc = jnp.where(mask > 0.0, sc_row, f32(NEG))           # [16, T]
        gmax = jnp.max(msc, axis=-1, keepdims=True)             # [16, 1]
        ex = jnp.exp(msc - gmax) * mask                         # exact zeros off-group
        den = jnp.sum(ex, axis=-1, keepdims=True) + 1e-9
        num = jnp.dot(ex, x, preferred_element_type=f32)        # [16, H] (MXU)
        return num * pl.reciprocal(den, approx=True)

    # pooling scores via one tiny matmul each (no VPU-mul + lane-reduce chains)
    sc_se = jax.lax.dot_general(rv[1:3, :], qa, (((1,), (1,)), ((), ())),
                                preferred_element_type=f32)     # [2, TS]
    sc_c = jax.lax.dot_general(rv[3:4, :], cemb, (((1,), (1,)), ((), ())),
                               preferred_element_type=f32)      # [1, TC]
    supp_mask = consts_ref[0:16, :][:, :TS]
    ent_mask = consts_ref[16:32, :][:, :TS]
    cand_mask = consts_ref[32:48, :][:, :TC]
    x = (pool(sc_se[0:1, :], supp_mask, qa)
         + pool(sc_se[1:2, :], ent_mask, qa)
         + pool(sc_c, cand_mask, cemb))                         # [N_PAD, H]

    # 3) GNN stack: mean-aggregate neighbours + self transform + ReLU (2 layers),
    #    each as one merged K=256 matmul.
    adj = consts_ref[48:64, :][:, :N_PAD]                       # [16, 16]
    for l in range(2):
        agg = jnp.dot(adj, x, preferred_element_type=f32)
        h = (jnp.dot(jnp.concatenate([agg, x], axis=-1),
                     w_ref[2 * H + 2 * H * l: 2 * H + 2 * H * (l + 1), :],
                     preferred_element_type=f32)
             + rv[4 + l:5 + l, :])
        x = jnp.maximum(h, 0.0)

    # 4) HDEScorer MLPs applied to all (padded) node rows.
    ch = jnp.maximum(jnp.dot(x, w_ref[6 * H:7 * H, :], preferred_element_type=f32)
                     + rv[6:7, :], 0.0)
    cand_col = jnp.sum(ch * rv[7:8, :], axis=-1, keepdims=True) + rv[10:11, 0:1]  # [16,1]
    eh = jnp.maximum(jnp.dot(x, w_ref[7 * H:8 * H, :], preferred_element_type=f32)
                     + rv[8:9, :], 0.0)
    ent_col = jnp.sum(eh * rv[9:10, :], axis=-1, keepdims=True) + rv[10:11, 1:2]  # [16,1]

    # 5) candidate score + max over linked entity scores (additive bias, no selects).
    sel = consts_ref[64:80, :]                                  # [16, H]
    link_bias = consts_ref[80:96, :]                            # [16, H]
    nolink = consts_ref[96:97, :]                               # [1, H]
    cand_row = jnp.sum(sel * cand_col, axis=0, keepdims=True)   # [1, H]
    ent_row = jnp.maximum(jnp.max(ent_col + link_bias, axis=0, keepdims=True), nolink)
    final_row = cand_row + ent_row                              # lanes 0..NC-1 valid

    # lane-dense, sublane-full store; wrapper slices [:, 0, :NC]
    out_ref[0] = jnp.broadcast_to(final_row, (8, H))


# ----------------------------- parameters ------------------------------------
def init_params(key):
    ks = jax.random.split(key, 13)

    def w(k, shape, fan_in):
        return jax.random.normal(k, shape, jnp.float32) * (1.0 / math.sqrt(fan_in))

    # weight slab [8H, H]: co_ws, co_wc, gnn0_W, gnn0_Wself, gnn1_W, gnn1_Wself,
    #                      cand_scorer_W1, ent_scorer_W1
    weights = jnp.concatenate(
        [w(ks[0], (H, H), 2 * H), w(ks[1], (H, H), 2 * H),
         w(ks[2], (H, H), H), w(ks[3], (H, H), H),
         w(ks[4], (H, H), H), w(ks[5], (H, H), H),
         w(ks[6], (H, H), H), w(ks[7], (H, H), H)], axis=0)     # [1024, H]

    # row-vector slab [16, H]:
    #   0 co_b | 1 doc summariser w | 2 ent summariser w | 3 cand summariser w
    #   4 gnn_b0 | 5 gnn_b1 | 6 cs_b1 | 7 cs_w2 | 8 es_b1 | 9 es_w2
    #   10 b2 (lane0 cand, lane1 ent) | 11..15 unused
    rv = jnp.zeros((16, H), jnp.float32)
    rv = rv.at[1].set(w(ks[8], (H,), H))
    rv = rv.at[2].set(w(ks[9], (H,), H))
    rv = rv.at[3].set(w(ks[10], (H,), H))
    rv = rv.at[7].set(w(ks[11], (H,), H))
    rv = rv.at[9].set(w(ks[12], (H,), H))
    return {"weights": weights, "rowvecs": rv}


# ----------------------------- forward pass ----------------------------------
@jax.jit
def hde_forward(params, support_embs, query_embs, cand_embs):
    B = support_embs.shape[0]
    s_flat = support_embs.reshape(B, TS, H)
    c_flat = cand_embs.reshape(B, TC, H)

    out = pl.pallas_call(
        _hde_fused_kernel,
        out_shape=jax.ShapeDtypeStruct((B, 8, H), jnp.float32),
        grid=(B,),
        in_specs=[
            # per-example activations: streamed per grid step
            pl.BlockSpec((1, TS, H), lambda b: (b, 0, 0)),
            pl.BlockSpec((1, LQ, H), lambda b: (b, 0, 0)),
            pl.BlockSpec((1, TC, H), lambda b: (b, 0, 0)),
            # resident slabs: constant block index -> fetched once, stay in VMEM
            pl.BlockSpec((7 * N_PAD, H), lambda b: (0, 0)),
            pl.BlockSpec((8 * H, H), lambda b: (0, 0)),
            pl.BlockSpec((16, H), lambda b: (0, 0)),
        ],
        out_specs=pl.BlockSpec((1, 8, H), lambda b: (b, 0, 0)),
        compiler_params=pltpu.CompilerParams(
            dimension_semantics=("parallel",)),
    )(s_flat, query_embs, c_flat, CONSTS, params["weights"], params["rowvecs"])

    logits = out[:, 0, :NC]                                     # [B, NC] candidate logits
    pred_ids = jnp.argmax(logits, axis=-1)
    # finish(): CrossEntropyLoss against the answer id (same answer for every example here)
    losses = jax.nn.logsumexp(logits, axis=-1) - logits[:, ANSWER_ID]
    return losses.mean(), pred_ids, logits


# ----------------------------------- main -------------------------------------
if __name__ == "__main__":
    B = 4
    key = jax.random.PRNGKey(0)
    k_inp, k_par = jax.random.split(key)
    k1, k2, k3 = jax.random.split(k_inp, 3)

    support_embs = jax.random.normal(k1, (B, NS, LS, H), jnp.float32)   # embedder(sup)
    query_embs = jax.random.normal(k2, (B, LQ, H), jnp.float32)         # embedder(query)
    cand_embs = jax.random.normal(k3, (B, NC, LC, H), jnp.float32)      # embedder(cand)

    params = init_params(k_par)

    loss, pred_ids, logits = hde_forward(params, support_embs, query_embs, cand_embs)
    jax.block_until_ready((loss, pred_ids, logits))
    print("KERNEL_OK")
</pallas_src>

<mosaic_0001>
module attributes {stable_mosaic.version = 11 : i64} {
  func.func @_hde_fused_kernel(%arg0: i32, %arg1: memref<1x48x128xf32, #tpu.memory_space<vmem>>, %arg2: memref<1x8x128xf32, #tpu.memory_space<vmem>>, %arg3: memref<1x32x128xf32, #tpu.memory_space<vmem>>, %arg4: memref<112x128xf32, #tpu.memory_space<vmem>>, %arg5: memref<1024x128xf32, #tpu.memory_space<vmem>>, %arg6: memref<16x128xf32, #tpu.memory_space<vmem>>, %arg7: memref<1x8x128xf32, #tpu.memory_space<vmem>>) attributes {dimension_semantics = [#tpu.dimension_semantics<parallel>], iteration_bounds = array<i64: 4>, scalar_prefetch = 0 : i64, scratch_operands = 0 : i64, tpu.core_type = #tpu.core_type<tc>, window_params = [{transform_indices = @transform_0, window_bounds = array<i64: 1, 48, 128>}, {transform_indices = @transform_1, window_bounds = array<i64: 1, 8, 128>}, {transform_indices = @transform_2, window_bounds = array<i64: 1, 32, 128>}, {pipeline_mode = #tpu.pipeline_mode<synchronous>, transform_indices = @transform_3, window_bounds = array<i64: 112, 128>}, {pipeline_mode = #tpu.pipeline_mode<synchronous>, transform_indices = @transform_4, window_bounds = array<i64: 1024, 128>}, {pipeline_mode = #tpu.pipeline_mode<synchronous>, transform_indices = @transform_5, window_bounds = array<i64: 16, 128>}, {transform_indices = @transform_6, window_bounds = array<i64: 1, 8, 128>}]} {
    %c0 = arith.constant 0 : index
    %c0_0 = arith.constant 0 : index
    %c0_1 = arith.constant 0 : index
    %0 = vector.load %arg1[%c0, %c0_0, %c0_1] : memref<1x48x128xf32, #tpu.memory_space<vmem>>, vector<1x48x128xf32>
    %1 = vector.shape_cast %0 : vector<1x48x128xf32> to vector<48x128xf32>
    %c0_2 = arith.constant 0 : index
    %c0_3 = arith.constant 0 : index
    %c0_4 = arith.constant 0 : index
    %2 = vector.load %arg2[%c0_2, %c0_3, %c0_4] : memref<1x8x128xf32, #tpu.memory_space<vmem>>, vector<1x8x128xf32>
    %3 = vector.shape_cast %2 : vector<1x8x128xf32> to vector<8x128xf32>
    %c0_5 = arith.constant 0 : index
    %c0_6 = arith.constant 0 : index
    %c0_7 = arith.constant 0 : index
    %4 = vector.load %arg3[%c0_5, %c0_6, %c0_7] : memref<1x32x128xf32, #tpu.memory_space<vmem>>, vector<1x32x128xf32>
    %5 = vector.shape_cast %4 : vector<1x32x128xf32> to vector<32x128xf32>
    %c0_8 = arith.constant 0 : index
    %c0_9 = arith.constant 0 : index
    %6 = vector.load %arg6[%c0_8, %c0_9] : memref<16x128xf32, #tpu.memory_space<vmem>>, vector<16x128xf32>
    %cst = arith.constant dense<0.000000e+00> : vector<48x8xf32>
    %7 = tpu.matmul %1, %3, %cst {dimension_numbers = #tpu.dot_dimension_numbers<[1], [1], [0], [0], [0, 0, 1, 0], [], []>} : vector<48x128xf32>, vector<8x128xf32>, vector<48x8xf32> -> vector<48x8xf32>
    %cst_10 = arith.constant dense<0xFF800000> : vector<48xf32>
    %8 = vector.multi_reduction <maximumf>, %7, %cst_10 [1] : vector<48x8xf32> to vector<48xf32>
    %9 = vector.shape_cast %8 : vector<48xf32> to vector<48x1xf32>
    %10 = vector.broadcast %9 : vector<48x1xf32> to vector<48x8xf32>
    %11 = arith.subf %7, %10 : vector<48x8xf32>
    %12 = math.exp %11 : vector<48x8xf32>
    %cst_11 = arith.constant dense<0.000000e+00> : vector<48xf32>
    %13 = vector.multi_reduction <add>, %12, %cst_11 [1] : vector<48x8xf32> to vector<48xf32>
    %14 = vector.shape_cast %13 : vector<48xf32> to vector<48x1xf32>
    %15 = tpu.reciprocal %14 {approx = true} : vector<48x1xf32> -> vector<48x1xf32>
    %16 = vector.broadcast %15 : vector<48x1xf32> to vector<48x8xf32>
    %17 = arith.mulf %12, %16 : vector<48x8xf32>
    %cst_12 = arith.constant dense<0.000000e+00> : vector<48x128xf32>
    %18 = tpu.matmul %17, %3, %cst_12 {dimension_numbers = #tpu.dot_dimension_numbers<[1], [0], [0], [1], [0, 0, 1, 1], [], []>} : vector<48x8xf32>, vector<8x128xf32>, vector<48x128xf32> -> vector<48x128xf32>
    %19 = tpu.concatenate %1, %18 in 1 : vector<48x128xf32>, vector<48x128xf32> -> vector<48x256xf32>
    %c0_13 = arith.constant 0 : index
    %c0_14 = arith.constant 0 : index
    %20 = vector.load %arg5[%c0_13, %c0_14] : memref<1024x128xf32, #tpu.memory_space<vmem>>, vector<256x128xf32>
    %cst_15 = arith.constant dense<0.000000e+00> : vector<48x128xf32>
    %21 = tpu.matmul %19, %20, %cst_15 {dimension_numbers = #tpu.dot_dimension_numbers<[1], [0], [0], [1], [0, 0, 1, 1], [], []>} : vector<48x256xf32>, vector<256x128xf32>, vector<48x128xf32> -> vector<48x128xf32>
    %22 = vector.extract_strided_slice %6 {offsets = [0, 0], sizes = [1, 128], strides = [1, 1]} : vector<16x128xf32> to vector<1x128xf32>
    %23 = vector.broadcast %22 : vector<1x128xf32> to vector<48x128xf32>
    %24 = arith.addf %21, %23 : vector<48x128xf32>
    %cst_16 = arith.constant 0.000000e+00 : f32
    %25 = vector.broadcast %cst_16 : f32 to vector<48x128xf32>
    %26 = arith.maximumf %24, %25 : vector<48x128xf32>
    %27 = vector.extract_strided_slice %6 {offsets = [1, 0], sizes = [2, 128], strides = [1, 1]} : vector<16x128xf32> to vector<2x128xf32>
    %cst_17 = arith.constant dense<0.000000e+00> : vector<2x48xf32>
    %28 = tpu.matmul %27, %26, %cst_17 {dimension_numbers = #tpu.dot_dimension_numbers<[1], [1], [0], [0], [0, 0, 1, 0], [], []>} : vector<2x128xf32>, vector<48x128xf32>, vector<2x48xf32> -> vector<2x48xf32>
    %29 = vector.extract_strided_slice %6 {offsets = [3, 0], sizes = [1, 128], strides = [1, 1]} : vector<16x128xf32> to vector<1x128xf32>
    %cst_18 = arith.constant dense<0.000000e+00> : vector<1x32xf32>
    %30 = tpu.matmul %29, %5, %cst_18 {dimension_numbers = #tpu.dot_dimension_numbers<[1], [1], [0], [0], [0, 0, 1, 0], [], []>} : vector<1x128xf32>, vector<32x128xf32>, vector<1x32xf32> -> vector<1x32xf32>
    %c0_19 = arith.constant 0 : index
    %c0_20 = arith.constant 0 : index
    %31 = vector.load %arg4[%c0_19, %c0_20] : memref<112x128xf32, #tpu.memory_space<vmem>>, vector<16x128xf32>
    %32 = vector.extract_strided_slice %31 {offsets = [0, 0], sizes = [16, 48], strides = [1, 1]} : vector<16x128xf32> to vector<16x48xf32>
    %c16 = arith.constant 16 : index
    %c0_21 = arith.constant 0 : index
    %33 = vector.load %arg4[%c16, %c0_21] : memref<112x128xf32, #tpu.memory_space<vmem>>, vector<16x128xf32>
    %34 = vector.extract_strided_slice %33 {offsets = [0, 0], sizes = [16, 48], strides = [1, 1]} : vector<16x128xf32> to vector<16x48xf32>
    %c32 = arith.constant 32 : index
    %c0_22 = arith.constant 0 : index
    %35 = vector.load %arg4[%c32, %c0_22] : memref<112x128xf32, #tpu.memory_space<vmem>>, vector<16x128xf32>
    %36 = vector.extract_strided_slice %35 {offsets = [0, 0], sizes = [16, 32], strides = [1, 1]} : vector<16x128xf32> to vector<16x32xf32>
    %37 = vector.extract_strided_slice %28 {offsets = [0, 0], sizes = [1, 48], strides = [1, 1]} : vector<2x48xf32> to vector<1x48xf32>
    %cst_23 = arith.constant 0.000000e+00 : f32
    %38 = vector.broadcast %cst_23 : f32 to vector<16x48xf32>
    %39 = arith.cmpf ogt, %32, %38 : vector<16x48xf32>
    %cst_24 = arith.constant -1.000000e+30 : f32
    %40 = vector.shape_cast %37 : vector<1x48xf32> to vector<1x48xf32>
    %41 = vector.broadcast %40 : vector<1x48xf32> to vector<16x48xf32>
    %42 = vector.broadcast %cst_24 : f32 to vector<16x48xf32>
    %43 = arith.select %39, %41, %42 : vector<16x48xi1>, vector<16x48xf32>
    %cst_25 = arith.constant dense<0xFF800000> : vector<16xf32>
    %44 = vector.multi_reduction <maximumf>, %43, %cst_25 [1] : vector<16x48xf32> to vector<16xf32>
    %45 = vector.shape_cast %44 : vector<16xf32> to vector<16x1xf32>
    %46 = vector.broadcast %45 : vector<16x1xf32> to vector<16x48xf32>
    %47 = arith.subf %43, %46 : vector<16x48xf32>
    %48 = math.exp %47 : vector<16x48xf32>
    %49 = arith.mulf %48, %32 : vector<16x48xf32>
    %cst_26 = arith.constant dense<0.000000e+00> : vector<16xf32>
    %50 = vector.multi_reduction <add>, %49, %cst_26 [1] : vector<16x48xf32> to vector<16xf32>
    %51 = vector.shape_cast %50 : vector<16xf32> to vector<16x1xf32>
    %cst_27 = arith.constant 9.99999971E-10 : f32
    %52 = vector.broadcast %cst_27 : f32 to vector<16x1xf32>
    %53 = arith.addf %51, %52 : vector<16x1xf32>
    %cst_28 = arith.constant dense<0.000000e+00> : vector<16x128xf32>
    %54 = tpu.matmul %49, %26, %cst_28 {dimension_numbers = #tpu.dot_dimension_numbers<[1], [0], [0], [1], [0, 0, 1, 1], [], []>} : vector<16x48xf32>, vector<48x128xf32>, vector<16x128xf32> -> vector<16x128xf32>
    %55 = tpu.reciprocal %53 {approx = true} : vector<16x1xf32> -> vector<16x1xf32>
    %56 = vector.broadcast %55 : vector<16x1xf32> to vector<16x128xf32>
    %57 = arith.mulf %54, %56 : vector<16x128xf32>
    %58 = vector.extract_strided_slice %28 {offsets = [1, 0], sizes = [1, 48], strides = [1, 1]} : vector<2x48xf32> to vector<1x48xf32>
    %cst_29 = arith.constant 0.000000e+00 : f32
    %59 = vector.broadcast %cst_29 : f32 to vector<16x48xf32>
    %60 = arith.cmpf ogt, %34, %59 : vector<16x48xf32>
    %cst_30 = arith.constant -1.000000e+30 : f32
    %61 = vector.shape_cast %58 : vector<1x48xf32> to vector<1x48xf32>
    %62 = vector.broadcast %61 : vector<1x48xf32> to vector<16x48xf32>
    %63 = vector.broadcast %cst_30 : f32 to vector<16x48xf32>
    %64 = arith.select %60, %62, %63 : vector<16x48xi1>, vector<16x48xf32>
    %cst_31 = arith.constant dense<0xFF800000> : vector<16xf32>
    %65 = vector.multi_reduction <maximumf>, %64, %cst_31 [1] : vector<16x48xf32> to vector<16xf32>
    %66 = vector.shape_cast %65 : vector<16xf32> to vector<16x1xf32>
    %67 = vector.broadcast %66 : vector<16x1xf32> to vector<16x48xf32>
    %68 = arith.subf %64, %67 : vector<16x48xf32>
    %69 = math.exp %68 : vector<16x48xf32>
    %70 = arith.mulf %69, %34 : vector<16x48xf32>
    %cst_32 = arith.constant dense<0.000000e+00> : vector<16xf32>
    %71 = vector.multi_reduction <add>, %70, %cst_32 [1] : vector<16x48xf32> to vector<16xf32>
    %72 = vector.shape_cast %71 : vector<16xf32> to vector<16x1xf32>
    %cst_33 = arith.constant 9.99999971E-10 : f32
    %73 = vector.broadcast %cst_33 : f32 to vector<16x1xf32>
    %74 = arith.addf %72, %73 : vector<16x1xf32>
    %cst_34 = arith.constant dense<0.000000e+00> : vector<16x128xf32>
    %75 = tpu.matmul %70, %26, %cst_34 {dimension_numbers = #tpu.dot_dimension_numbers<[1], [0], [0], [1], [0, 0, 1, 1], [], []>} : vector<16x48xf32>, vector<48x128xf32>, vector<16x128xf32> -> vector<16x128xf32>
    %76 = tpu.reciprocal %74 {approx = true} : vector<16x1xf32> -> vector<16x1xf32>
    %77 = vector.broadcast %76 : vector<16x1xf32> to vector<16x128xf32>
    %78 = arith.mulf %75, %77 : vector<16x128xf32>
    %79 = arith.addf %57, %78 : vector<16x128xf32>
    %cst_35 = arith.constant 0.000000e+00 : f32
    %80 = vector.broadcast %cst_35 : f32 to vector<16x32xf32>
    %81 = arith.cmpf ogt, %36, %80 : vector<16x32xf32>
    %cst_36 = arith.constant -1.000000e+30 : f32
    %82 = vector.shape_cast %30 : vector<1x32xf32> to vector<1x32xf32>
    %83 = vector.broadcast %82 : vector<1x32xf32> to vector<16x32xf32>
    %84 = vector.broadcast %cst_36 : f32 to vector<16x32xf32>
    %85 = arith.select %81, %83, %84 : vector<16x32xi1>, vector<16x32xf32>
    %cst_37 = arith.constant dense<0xFF800000> : vector<16xf32>
    %86 = vector.multi_reduction <maximumf>, %85, %cst_37 [1] : vector<16x32xf32> to vector<16xf32>
    %87 = vector.shape_cast %86 : vector<16xf32> to vector<16x1xf32>
    %88 = vector.broadcast %87 : vector<16x1xf32> to vector<16x32xf32>
    %89 = arith.subf %85, %88 : vector<16x32xf32>
    %90 = math.exp %89 : vector<16x32xf32>
    %91 = arith.mulf %90, %36 : vector<16x32xf32>
    %cst_38 = arith.constant dense<0.000000e+00> : vector<16xf32>
    %92 = vector.multi_reduction <add>, %91, %cst_38 [1] : vector<16x32xf32> to vector<16xf32>
    %93 = vector.shape_cast %92 : vector<16xf32> to vector<16x1xf32>
    %cst_39 = arith.constant 9.99999971E-10 : f32
    %94 = vector.broadcast %cst_39 : f32 to vector<16x1xf32>
    %95 = arith.addf %93, %94 : vector<16x1xf32>
    %cst_40 = arith.constant dense<0.000000e+00> : vector<16x128xf32>
    %96 = tpu.matmul %91, %5, %cst_40 {dimension_numbers = #tpu.dot_dimension_numbers<[1], [0], [0], [1], [0, 0, 1, 1], [], []>} : vector<16x32xf32>, vector<32x128xf32>, vector<16x128xf32> -> vector<16x128xf32>
    %97 = tpu.reciprocal %95 {approx = true} : vector<16x1xf32> -> vector<16x1xf32>
    %98 = vector.broadcast %97 : vector<16x1xf32> to vector<16x128xf32>
    %99 = arith.mulf %96, %98 : vector<16x128xf32>
    %100 = arith.addf %79, %99 : vector<16x128xf32>
    %c48 = arith.constant 48 : index
    %c0_41 = arith.constant 0 : index
    %101 = vector.load %arg4[%c48, %c0_41] : memref<112x128xf32, #tpu.memory_space<vmem>>, vector<16x128xf32>
    %102 = vector.extract_strided_slice %101 {offsets = [0, 0], sizes = [16, 16], strides = [1, 1]} : vector<16x128xf32> to vector<16x16xf32>
    %cst_42 = arith.constant dense<0.000000e+00> : vector<16x128xf32>
    %103 = tpu.matmul %102, %100, %cst_42 {dimension_numbers = #tpu.dot_dimension_numbers<[1], [0], [0], [1], [0, 0, 1, 1], [], []>} : vector<16x16xf32>, vector<16x128xf32>, vector<16x128xf32> -> vector<16x128xf32>
    %104 = tpu.concatenate %103, %100 in 1 : vector<16x128xf32>, vector<16x128xf32> -> vector<16x256xf32>
    %c256 = arith.constant 256 : index
    %c0_43 = arith.constant 0 : index
    %105 = vector.load %arg5[%c256, %c0_43] : memref<1024x128xf32, #tpu.memory_space<vmem>>, vector<256x128xf32>
    %cst_44 = arith.constant dense<0.000000e+00> : vector<16x128xf32>
    %106 = tpu.matmul %104, %105, %cst_44 {dimension_numbers = #tpu.dot_dimension_numbers<[1], [0], [0], [1], [0, 0, 1, 1], [], []>} : vector<16x256xf32>, vector<256x128xf32>, vector<16x128xf32> -> vector<16x128xf32>
    %107 = vector.extract_strided_slice %6 {offsets = [4, 0], sizes = [1, 128], strides = [1, 1]} : vector<16x128xf32> to vector<1x128xf32>
    %108 = vector.broadcast %107 : vector<1x128xf32> to vector<16x128xf32>
    %109 = arith.addf %106, %108 : vector<16x128xf32>
    %cst_45 = arith.constant 0.000000e+00 : f32
    %110 = vector.broadcast %cst_45 : f32 to vector<16x128xf32>
    %111 = arith.maximumf %109, %110 : vector<16x128xf32>
    %cst_46 = arith.constant dense<0.000000e+00> : vector<16x128xf32>
    %112 = tpu.matmul %102, %111, %cst_46 {dimension_numbers = #tpu.dot_dimension_numbers<[1], [0], [0], [1], [0, 0, 1, 1], [], []>} : vector<16x16xf32>, vector<16x128xf32>, vector<16x128xf32> -> vector<16x128xf32>
    %113 = tpu.concatenate %112, %111 in 1 : vector<16x128xf32>, vector<16x128xf32> -> vector<16x256xf32>
    %c512 = arith.constant 512 : index
    %c0_47 = arith.constant 0 : index
    %114 = vector.load %arg5[%c512, %c0_47] : memref<1024x128xf32, #tpu.memory_space<vmem>>, vector<256x128xf32>
    %cst_48 = arith.constant dense<0.000000e+00> : vector<16x128xf32>
    %115 = tpu.matmul %113, %114, %cst_48 {dimension_numbers = #tpu.dot_dimension_numbers<[1], [0], [0], [1], [0, 0, 1, 1], [], []>} : vector<16x256xf32>, vector<256x128xf32>, vector<16x128xf32> -> vector<16x128xf32>
    %116 = vector.extract_strided_slice %6 {offsets = [5, 0], sizes = [1, 128], strides = [1, 1]} : vector<16x128xf32> to vector<1x128xf32>
    %117 = vector.broadcast %116 : vector<1x128xf32> to vector<16x128xf32>
    %118 = arith.addf %115, %117 : vector<16x128xf32>
    %cst_49 = arith.constant 0.000000e+00 : f32
    %119 = vector.broadcast %cst_49 : f32 to vector<16x128xf32>
    %120 = arith.maximumf %118, %119 : vector<16x128xf32>
    %c768 = arith.constant 768 : index
    %c0_50 = arith.constant 0 : index
    %121 = vector.load %arg5[%c768, %c0_50] : memref<1024x128xf32, #tpu.memory_space<vmem>>, vector<128x128xf32>
    %cst_51 = arith.constant dense<0.000000e+00> : vector<16x128xf32>
    %122 = tpu.matmul %120, %121, %cst_51 {dimension_numbers = #tpu.dot_dimension_numbers<[1], [0], [0], [1], [0, 0, 1, 1], [], []>} : vector<16x128xf32>, vector<128x128xf32>, vector<16x128xf32> -> vector<16x128xf32>
    %123 = vector.extract_strided_slice %6 {offsets = [6, 0], sizes = [1, 128], strides = [1, 1]} : vector<16x128xf32> to vector<1x128xf32>
    %124 = vector.broadcast %123 : vector<1x128xf32> to vector<16x128xf32>
    %125 = arith.addf %122, %124 : vector<16x128xf32>
    %cst_52 = arith.constant 0.000000e+00 : f32
    %126 = vector.broadcast %cst_52 : f32 to vector<16x128xf32>
    %127 = arith.maximumf %125, %126 : vector<16x128xf32>
    %128 = vector.extract_strided_slice %6 {offsets = [7, 0], sizes = [1, 128], strides = [1, 1]} : vector<16x128xf32> to vector<1x128xf32>
    %129 = vector.broadcast %128 : vector<1x128xf32> to vector<16x128xf32>
    %130 = arith.mulf %127, %129 : vector<16x128xf32>
    %cst_53 = arith.constant dense<0.000000e+00> : vector<16xf32>
    %131 = vector.multi_reduction <add>, %130, %cst_53 [1] : vector<16x128xf32> to vector<16xf32>
    %132 = vector.shape_cast %131 : vector<16xf32> to vector<16x1xf32>
    %133 = vector.extract_strided_slice %6 {offsets = [10, 0], sizes = [1, 1], strides = [1, 1]} : vector<16x128xf32> to vector<1x1xf32>
    %134 = vector.broadcast %133 : vector<1x1xf32> to vector<16x1xf32>
    %135 = arith.addf %132, %134 : vector<16x1xf32>
    %c896 = arith.constant 896 : index
    %c0_54 = arith.constant 0 : index
    %136 = vector.load %arg5[%c896, %c0_54] : memref<1024x128xf32, #tpu.memory_space<vmem>>, vector<128x128xf32>
    %cst_55 = arith.constant dense<0.000000e+00> : vector<16x128xf32>
    %137 = tpu.matmul %120, %136, %cst_55 {dimension_numbers = #tpu.dot_dimension_numbers<[1], [0], [0], [1], [0, 0, 1, 1], [], []>} : vector<16x128xf32>, vector<128x128xf32>, vector<16x128xf32> -> vector<16x128xf32>
    %138 = vector.extract_strided_slice %6 {offsets = [8, 0], sizes = [1, 128], strides = [1, 1]} : vector<16x128xf32> to vector<1x128xf32>
    %139 = vector.broadcast %138 : vector<1x128xf32> to vector<16x128xf32>
    %140 = arith.addf %137, %139 : vector<16x128xf32>
    %cst_56 = arith.constant 0.000000e+00 : f32
    %141 = vector.broadcast %cst_56 : f32 to vector<16x128xf32>
    %142 = arith.maximumf %140, %141 : vector<16x128xf32>
    %143 = vector.extract_strided_slice %6 {offsets = [9, 0], sizes = [1, 128], strides = [1, 1]} : vector<16x128xf32> to vector<1x128xf32>
    %144 = vector.broadcast %143 : vector<1x128xf32> to vector<16x128xf32>
    %145 = arith.mulf %142, %144 : vector<16x128xf32>
    %cst_57 = arith.constant dense<0.000000e+00> : vector<16xf32>
    %146 = vector.multi_reduction <add>, %145, %cst_57 [1] : vector<16x128xf32> to vector<16xf32>
    %147 = vector.shape_cast %146 : vector<16xf32> to vector<16x1xf32>
    %148 = vector.extract_strided_slice %6 {offsets = [10, 1], sizes = [1, 1], strides = [1, 1]} : vector<16x128xf32> to vector<1x1xf32>
    %149 = vector.broadcast %148 : vector<1x1xf32> to vector<16x1xf32>
    %150 = arith.addf %147, %149 : vector<16x1xf32>
    %c64 = arith.constant 64 : index
    %c0_58 = arith.constant 0 : index
    %151 = vector.load %arg4[%c64, %c0_58] : memref<112x128xf32, #tpu.memory_space<vmem>>, vector<16x128xf32>
    %c80 = arith.constant 80 : index
    %c0_59 = arith.constant 0 : index
    %152 = vector.load %arg4[%c80, %c0_59] : memref<112x128xf32, #tpu.memory_space<vmem>>, vector<16x128xf32>
    %c96 = arith.constant 96 : index
    %c0_60 = arith.constant 0 : index
    %153 = vector.load %arg4[%c96, %c0_60] : memref<112x128xf32, #tpu.memory_space<vmem>>, vector<1x128xf32>
    %154 = vector.broadcast %135 : vector<16x1xf32> to vector<16x128xf32>
    %155 = arith.mulf %151, %154 : vector<16x128xf32>
    %cst_61 = arith.constant dense<0.000000e+00> : vector<128xf32>
    %156 = vector.multi_reduction <add>, %155, %cst_61 [0] : vector<16x128xf32> to vector<128xf32>
    %157 = vector.shape_cast %156 : vector<128xf32> to vector<1x128xf32>
    %158 = vector.broadcast %150 : vector<16x1xf32> to vector<16x128xf32>
    %159 = arith.addf %158, %152 : vector<16x128xf32>
    %cst_62 = arith.constant dense<0xFF800000> : vector<128xf32>
    %160 = vector.multi_reduction <maximumf>, %159, %cst_62 [0] : vector<16x128xf32> to vector<128xf32>
    %161 = vector.shape_cast %160 : vector<128xf32> to vector<1x128xf32>
    %162 = arith.maximumf %161, %153 : vector<1x128xf32>
    %163 = arith.addf %157, %162 : vector<1x128xf32>
    %164 = vector.shape_cast %163 : vector<1x128xf32> to vector<1x128xf32>
    %165 = vector.broadcast %164 : vector<1x128xf32> to vector<8x128xf32>
    %c0_63 = arith.constant 0 : index
    %c0_64 = arith.constant 0 : index
    %c0_65 = arith.constant 0 : index
    %166 = vector.load %arg7[%c0_63, %c0_64, %c0_65] : memref<1x8x128xf32, #tpu.memory_space<vmem>>, vector<1x8x128xf32>
    %167 = vector.shape_cast %166 : vector<1x8x128xf32> to vector<8x128xf32>
    %168 = vector.shape_cast %165 : vector<8x128xf32> to vector<1x8x128xf32>
    tpu.vector_store %arg7[%c0_63, %c0_64, %c0_65], %168 {strides = array<i32>} : memref<1x8x128xf32, #tpu.memory_space<vmem>>, vector<1x8x128xf32>,
    return
  }
  func.func @transform_0(%arg0: i32) -> (i32, i32, i32) {
    %c0_i32 = arith.constant 0 : i32
    %c0_i32_0 = arith.constant 0 : i32
    %c0_i32_1 = arith.constant 0 : i32
    return %arg0, %c0_i32, %c0_i32_0 : i32, i32, i32
  }
  func.func @transform_1(%arg0: i32) -> (i32, i32, i32) {
    %c0_i32 = arith.constant 0 : i32
    %c0_i32_0 = arith.constant 0 : i32
    %c0_i32_1 = arith.constant 0 : i32
    return %arg0, %c0_i32, %c0_i32_0 : i32, i32, i32
  }
  func.func @transform_2(%arg0: i32) -> (i32, i32, i32) {
    %c0_i32 = arith.constant 0 : i32
    %c0_i32_0 = arith.constant 0 : i32
    %c0_i32_1 = arith.constant 0 : i32
    return %arg0, %c0_i32, %c0_i32_0 : i32, i32, i32
  }
  func.func @transform_3(%arg0: i32) -> (i32, i32) {
    %c0_i32 = arith.constant 0 : i32
    %c0_i32_0 = arith.constant 0 : i32
    %c0_i32_1 = arith.constant 0 : i32
    return %c0_i32, %c0_i32_0 : i32, i32
  }
  func.func @transform_4(%arg0: i32) -> (i32, i32) {
    %c0_i32 = arith.constant 0 : i32
    %c0_i32_0 = arith.constant 0 : i32
    %c0_i32_1 = arith.constant 0 : i32
    return %c0_i32, %c0_i32_0 : i32, i32
  }
  func.func @transform_5(%arg0: i32) -> (i32, i32) {
    %c0_i32 = arith.constant 0 : i32
    %c0_i32_0 = arith.constant 0 : i32
    %c0_i32_1 = arith.constant 0 : i32
    return %c0_i32, %c0_i32_0 : i32, i32
  }
  func.func @transform_6(%arg0: i32) -> (i32, i32, i32) {
    %c0_i32 = arith.constant 0 : i32
    %c0_i32_0 = arith.constant 0 : i32
    %c0_i32_1 = arith.constant 0 : i32
    return %arg0, %c0_i32, %c0_i32_0 : i32, i32, i32
  }
}

</mosaic_0001>

<bundles_post_ra>
// kernel: hde_forward.1
= control target key start
LH: loop header
LB: loop body
LE: loop exit
PB: predicated region body
PF: predicated region fallthrough
CT: control target
= control target key end

     0   :  { %s3342_s0 = inlined_call_operand.hbm [shape: f32[4,48,128], index: 0, kind: input, shape index: {}]   ;;  %s3343_s1 = inlined_call_operand.hbm [shape: f32[4,8,128], index: 1, kind: input, shape index: {}]   ;;  %s3344_s2 = inlined_call_operand.hbm [shape: f32[4,32,128], index: 2, kind: input, shape index: {}]   ;;  %s3345_s3 = inlined_call_operand.hbm [shape: f32[112,128], index: 3, kind: input, shape index: {}]   ;;  %s3346_s4 = inlined_call_operand.hbm [shape: f32[1024,128], index: 4, kind: input, shape index: {}]   ;;  %s3347_s5 = inlined_call_operand.hbm [shape: f32[16,128], index: 5, kind: input, shape index: {}]   ;;  %s3348_s6 = inlined_call_operand.vmem [shape: f32[4,8,128], index: 6, kind: output, shape index: {}]  }
   0x1   :  { %3359 = sst [smem:[#allocation16_spill]] %s3343_s1 }
   0x2   :  { %3360 = sst [smem:[#allocation17_spill]] %s3345_s3 }
   0x3   :  { %3361 = sst [smem:[#allocation18_spill]] %s3346_s4 }
   0x4   :  { %11 = vsyncpa [#allocation3], 0 }
   0x5   :  { %13 = vsyncpa [#allocation3 + $0x1], 0 }
   0x6   :  { %14 = vsyncpa [#allocation5], 0 }
   0x7   :  { %16 = vsyncpa [#allocation5 + $0x1], 0 }
   0x8   :  { %17 = vsyncpa [#allocation8], 0 }
   0x9   :  { %18 = vsyncpa [#allocation11], 0  ;;  %s2936_s21 = smov 0   ;;  %s2938_s22 = smov 0  }
   0xa   :  { %s2940_s23 = smov 0   ;;  %s2942_s24 = smov 0  }
   0xb LB: > { %s2955_s25 = sadd.s32 4294967295, %s2887_s24   ;;  %p44_p0 = scmp.ne.s32.totalorder %s2879_s22, %s2875_s21  ;;  %s2887_s24 = sphi %s2942_s24, %s3385_s24   ;;  %s2883_s23 = sphi %s2940_s23, %s3384_s23   ;;  %s2879_s22 = sphi %s2938_s22, %s3383_s22   ;;  %s2875_s21 = sphi %s2936_s21, %s3382_s21  }
   0xc   : > { %p3351_p1 = scmp.eq.s32.totalorder %s2955_s25, 0  ;;  %p2110_p2 = scmp.ge.s32.totalorder %s2887_s24, 1 }
   0xd   : > { %p196_p3 = scmp.lt.s32.totalorder %s2887_s24, 5  ;;  %s2889_s28 = smov [#allocation7]  }
   0xe   : > { %p2963_p4 = por %p3351_p1, %p44_p0  ;;  %s208_s29 = sshll.u32 %s2889_s28, 4  ;;  %s209_s29 = int_to_ptr.vmem [resolvable:$true] %s208_s29 }
   0xf   : > { %p2967_p5 = pnand %p2110_p2, %p196_p3  ;;  %s2980_s7 = sadd.s32 1, %s2887_s24  }
  0x10   : > { %s3362_s26 = scalar_select %p2963_p4, 1, 0 }
  0x11   : > { %s3363_s27 = scalar_select %p2967_p5, 1, 0 }
  0x12   : > { %p2559_p6 = pneg %p2967_p5  ;;  %s31_s8 = sadd.s32 1, %s2883_s23 }
  0x13   : > { %s28_s9 = ssub.s32 %s2887_s24, %s2980_s7  ;;  %s2690_s10 = scalar_lea.vmem %s209_s29, 1792 }
  0x14   : > { %p2975_p7 = pnand %p2559_p6, %p3351_p1  ;;  %p2691_p9 = scmp.ne.s32.totalorder %s209_s29, %s2690_s10 }
  0x15   : > { %p2698_p12 = scmp.lt.s32.totalorder %s209_s29, %s209_s29  ;;  %p2699_p13 = scmp.lt.s32.totalorder %s2690_s10, %s2690_s10 }
  0x16   : > { %s3364_s30 = scalar_select %p2975_p7, 1, 0 }
  0x17   : > { %p3352_p8 = pneg %p2975_p7  ;;  %p2700_p0 = por %p2699_p13, %p2698_p12 }
  0x19   : > { %p2693_p10 = pnand %p2691_p9, %p3352_p8 }
  0x1b   : > { %p2694_p11 = pneg %p2693_p10 }
  0x1d   : > { %p2701_p2 = pnand %p2700_p0, %p2694_p11 }
  0x1f   : > { %2704 = shalt.err (!%p2701_p2)
}
  0x20   : > { %s3349_s11 = smov 128   ;;  %s3354_s12 = smov 8  }
  0x21   : > { %s3365_s3 = sld [smem:[#allocation17_spill]]  ;;  %p29_p3 = scmp.eq.s32.totalorder %s28_s9, 0 }
  0x22   : > { %p38_p6 = scmp.ne.s32.totalorder %s2883_s23, %s2879_s22  ;;  %p39_p9 = scmp.eq.s32.totalorder %s2887_s24, 0 }
  0x23   : > { %p2582_p10 = scmp.lt.s32.totalorder %s2887_s24, 4  ;;  %s3006_s16 = sand.u32 1, %s2883_s23  }
  0x24   : > { %s3003_s15 = scalar_select %p29_p3, %s2883_s23, %s31_s8  }
  0x25   : > { %p40_p11 = por %p39_p9, %p38_p6  ;;  %s269_s17 = sand.u32 1, %s2887_s24  }
  0x26   : > { %s2116_s18 = sshll.u32 %s3006_s16, 3  ;;  %s2117_s20 = sshll.u32 %s2887_s24, 7 }
  0x27   : > { %2562 = dma.hbm_to_vmem [thread:$0]  (!%p2975_p7), %s3365_s3, 1792, %s209_s29, [#allocation8], %s3349_s11, %s3349_s11, %s3354_s12  }
  0x28   : > { %p3010_p12 = pnand %p2582_p10, %p40_p11  ;;  %s3367_s1 = sld [smem:[#allocation16_spill]] }
  0x29   : > { %s273_s8 = scalar_lea.vmem [#allocation4], %s2116_s18  ;;  %s3021_s13 = scalar_lea.sflag [#allocation5], %s269_s17 }
  0x2a   : > { %s280_s9 = sshll.u32 %s273_s8, 4  ;;  %p3027_p0 = pneg %p3010_p12  ;;  %s281_s9 = int_to_ptr.vmem [resolvable:$true] %s280_s9 }
  0x2e   : > { %s3018_s29 = scalar_lea.hbm %s3367_s1, %s2117_s20  ;;  %s2710_s18 = scalar_lea.hbm %s3367_s1, 512 }
  0x2f   : > { %s2705_s14 = scalar_lea.hbm %s3018_s29, 128  ;;  %p2711_p6 = scmp.lt.s32.totalorder %s3018_s29, %s3367_s1 }
  0x30   : > { %p2706_p13 = scmp.ne.s32.totalorder %s3018_s29, %s2705_s14  ;;  %p2712_p9 = scmp.lt.s32.totalorder %s2710_s18, %s2705_s14 }
  0x32   : > { %p2708_p2 = pnand %p3027_p0, %p2706_p13  ;;  %p2713_p10 = por %p2712_p9, %p2711_p6 }
  0x34   : > { %p2709_p3 = pneg %p2708_p2 }
  0x36   : > { %p2714_p11 = pnand %p2713_p10, %p2709_p3 }
  0x38   : > { %2717 = shalt.err (!%p2714_p11)
}
  0x39   : > { %s2718_s17 = scalar_lea.vmem %s281_s9, 128  ;;  %s2892_s10 = smov [#allocation4]  }
  0x3a   : > { %p2719_p1 = scmp.ne.s32.totalorder %s281_s9, %s2718_s17  ;;  %s2723_s12 = sshll.u32 %s2892_s10, 4  ;;  %s2724_s12 = int_to_ptr.vmem [resolvable:$false] %s2723_s12 }
  0x3b   : > { %s2725_s3 = scalar_lea.vmem %s2724_s12, 256  ;;  %p2726_p13 = scmp.lt.s32.totalorder %s281_s9, %s2724_s12 }
  0x3c   : > { %p2721_p8 = pnand %p2719_p1, %p3027_p0  ;;  %p2727_p2 = scmp.lt.s32.totalorder %s2725_s3, %s2718_s17 }
  0x3e   : > { %p2722_p4 = pneg %p2721_p8  ;;  %p2728_p5 = por %p2727_p2, %p2726_p13 }
  0x40   : > { %p2729_p7 = pnand %p2728_p5, %p2722_p4 }
  0x42   : > { %2732 = shalt.err (!%p2729_p7)
}
  0x43   : > { %2575 = dma.hbm_to_vmem [thread:$0]  (!%p3010_p12), %s3018_s29, 128, %s281_s9, %s3021_s13  }
  0x44   : > { %s2893_s14 = smov [#allocation9]   ;;  %s2894_s21 = smov [#allocation10]  }
  0x45   : > { %s221_s20 = sshll.u32 %s2893_s14, 4  ;;  %s234_s18 = sshll.u32 %s2894_s21, 4  ;;  %s222_s20 = int_to_ptr.vmem [resolvable:$true] %s221_s20  ;;  %s235_s18 = int_to_ptr.vmem [resolvable:$true] %s234_s18 }
  0x46   : > { %s2744_s28 = scalar_lea.vmem %s222_s20, 16384  ;;  %p3369_p8 = scmp.ne.s32.totalorder %s3364_s30, 0 }
  0x47   : > { %p2745_p1 = scmp.ne.s32.totalorder %s222_s20, %s2744_s28  ;;  %p2752_p10 = scmp.lt.s32.totalorder %s222_s20, %s222_s20 }
  0x48   : > { %p3370_p3 = pneg %p3369_p8  ;;  %p2753_p4 = scmp.lt.s32.totalorder %s2744_s28, %s2744_s28 }
  0x4a   : > { %p2747_p6 = pnand %p2745_p1, %p3370_p3  ;;  %p2754_p5 = por %p2753_p4, %p2752_p10 }
  0x4c   : > { %p2748_p9 = pneg %p2747_p6 }
  0x4e   : > { %p2755_p7 = pnand %p2754_p5, %p2748_p9 }
  0x50   : > { %2758 = shalt.err (!%p2755_p7)
}
  0x51   : > { %s3371_s3 = smov 8   ;;  %s3372_s12 = smov 128  }
  0x52   : > { %s3373_s4 = sld [smem:[#allocation18_spill]]  ;;  %s2770_s10 = scalar_lea.vmem %s235_s18, 256 }
  0x53   : > { %p2771_p11 = scmp.ne.s32.totalorder %s235_s18, %s2770_s10  ;;  %p3374_p13 = pmov %p3370_p3 }
  0x54   : > { %p2778_p3 = scmp.lt.s32.totalorder %s235_s18, %s235_s18  ;;  %p2779_p6 = scmp.lt.s32.totalorder %s2770_s10, %s2770_s10 }
  0x55   : > { %p2773_p2 = pnand %p2771_p11, %p3374_p13 }
  0x56   : > { %p2780_p9 = por %p2779_p6, %p2778_p3 }
  0x57   : > { %p2774_p1 = pneg %p2773_p2 }
  0x58   : > { %2565 = dma.hbm_to_vmem [thread:$0]  (!%p3369_p8), %s3373_s4, 16384, %s222_s20, [#allocation8], %s3372_s12, %s3372_s12, %s3371_s3  }
  0x59   : > { %p2781_p10 = pnand %p2780_p9, %p2774_p1 }
  0x5b   : > { %2784 = shalt.err (!%p2781_p10)
}
  0x5c   : > { %2568 = dma.hbm_to_vmem [thread:$0]  (!%p3369_p8), %s3347_s5, 256, %s235_s18, [#allocation11], %s3372_s12, %s3372_s12, %s3371_s3  }
  0x5d   : > { %s2538_s14 = smul.u32 48, %s3006_s16  ;;  %s2146_s21 = sshll.u32 %s2887_s24, 9 }
  0x5e   : > { %s2539_s20 = smul.u32 768, %s2887_s24  ;;  %s3074_s30 = scalar_lea.hbm %s3344_s2, %s2146_s21 }
  0x5f   : > { %s252_s8 = scalar_lea.vmem [#allocation2], %s2538_s14  ;;  %s3375_s18 = sshll.u32 %s3006_s16, 5 }
  0x60   : > { %s3079_s1 = scalar_lea.hbm %s3342_s0, %s2539_s20  ;;  %s259_s17 = sshll.u32 %s252_s8, 4  ;;  %s3081_s17 = int_to_ptr.vmem [resolvable:$true] %s259_s17 }
  0x61   : > { %s3085_s4 = scalar_lea.vmem [#allocation6], %s3375_s18  ;;  %s249_s28 = scalar_lea.sflag [#allocation3], %s3006_s16 }
  0x62   : > { %s298_s24 = sshll.u32 %s3085_s4, 4  ;;  %s2785_s21 = scalar_lea.hbm %s3079_s1, 768  ;;  %s299_s24 = int_to_ptr.vmem [resolvable:$true] %s298_s24 }
  0x63   : > { %p2786_p8 = scmp.ne.s32.totalorder %s3079_s1, %s2785_s21  ;;  %s2790_s9 = scalar_lea.hbm %s3342_s0, 3072 }
  0x64   : > { %p2791_p7 = scmp.lt.s32.totalorder %s3079_s1, %s3342_s0  ;;  %p2792_p11 = scmp.lt.s32.totalorder %s2790_s9, %s2785_s21 }
  0x65   : > { %p2788_p4 = pnand %p2786_p8, %p3027_p0 }
  0x66   : > { %p2793_p13 = por %p2792_p11, %p2791_p7 }
  0x67   : > { %p2789_p5 = pneg %p2788_p4 }
  0x69   : > { %p2794_p2 = pnand %p2793_p13, %p2789_p5 }
  0x6b   : > { %2797 = shalt.err (!%p2794_p2)
}
  0x6c   : > { %s2798_s16 = scalar_lea.vmem %s3081_s17, 768  ;;  %s2895_s8 = smov [#allocation2]  }
  0x6d   : > { %p2799_p1 = scmp.ne.s32.totalorder %s3081_s17, %s2798_s16  ;;  %s2803_s18 = sshll.u32 %s2895_s8, 4  ;;  %s2804_s18 = int_to_ptr.vmem [resolvable:$false] %s2803_s18 }
  0x6e   : > { %s2805_s20 = scalar_lea.vmem %s2804_s18, 1536  ;;  %p2806_p9 = scmp.lt.s32.totalorder %s3081_s17, %s2804_s18 }
  0x6f   : > { %p2801_p3 = pnand %p2799_p1, %p3027_p0  ;;  %p2807_p10 = scmp.lt.s32.totalorder %s2805_s20, %s2798_s16 }
  0x71   : > { %p2802_p6 = pneg %p2801_p3  ;;  %p2808_p8 = por %p2807_p10, %p2806_p9 }
  0x73   : > { %p2809_p4 = pnand %p2808_p8, %p2802_p6 }
  0x75   : > { %2812 = shalt.err (!%p2809_p4)
}
  0x76   : > { %2572 = dma.hbm_to_vmem [thread:$0]  (!%p3010_p12), %s3079_s1, 768, %s3081_s17, %s249_s28, %s3372_s12, %s3372_s12, %s3371_s3  }
  0x77   : > { %s2813_s21 = scalar_lea.hbm %s3074_s30, 512  ;;  %s2818_s10 = scalar_lea.hbm %s3344_s2, 2048 }
  0x78   : > { %p2814_p5 = scmp.ne.s32.totalorder %s3074_s30, %s2813_s21  ;;  %p2819_p13 = scmp.lt.s32.totalorder %s3074_s30, %s3344_s2 }
  0x79   : > { %p2820_p2 = scmp.lt.s32.totalorder %s2818_s10, %s2813_s21 }
  0x7a   : > { %p2816_p7 = pnand %p2814_p5, %p3027_p0 }
  0x7b   : > { %p2821_p1 = por %p2820_p2, %p2819_p13 }
  0x7c   : > { %p2817_p11 = pneg %p2816_p7 }
  0x7e   : > { %p2822_p3 = pnand %p2821_p1, %p2817_p11 }
  0x80   : > { %2825 = shalt.err (!%p2822_p3)
}
  0x81   : > { %s2826_s1 = scalar_lea.vmem %s299_s24, 512  ;;  %s2896_s4 = smov [#allocation6]  }
  0x82   : > { %p2827_p6 = scmp.ne.s32.totalorder %s299_s24, %s2826_s1  ;;  %s2831_s17 = sshll.u32 %s2896_s4, 4  ;;  %s2832_s17 = int_to_ptr.vmem [resolvable:$false] %s2831_s17 }
  0x83   : > { %s2833_s28 = scalar_lea.vmem %s2832_s17, 1024  ;;  %p2834_p8 = scmp.lt.s32.totalorder %s299_s24, %s2832_s17 }
  0x84   : > { %p2829_p9 = pnand %p2827_p6, %p3027_p0  ;;  %p2835_p4 = scmp.lt.s32.totalorder %s2833_s28, %s2826_s1 }
  0x86   : > { %p2830_p10 = pneg %p2829_p9  ;;  %p2836_p5 = por %p2835_p4, %p2834_p8 }
  0x88   : > { %p2837_p7 = pnand %p2836_p5, %p2830_p10 }
  0x8a   : > { %2840 = shalt.err (!%p2837_p7)
}
  0x8b   : > { %2578 = dma.hbm_to_vmem [thread:$0]  (!%p3010_p12), %s3074_s30, 512, %s299_s24, %s3021_s13, %s3372_s12, %s3372_s12, %s3371_s3  }
  0x8c   : > { %p3376_p0 = scmp.ne.s32.totalorder %s3363_s27, 0 }
  0x8d   : > { %s312_s11 = sand.u32 (!%p3376_p0), 1, %s2879_s22   ;;  %p3377_p11 = scmp.ne.s32.totalorder (!%p3376_p0), %s3362_s26, 0 }
  0x8e   : > { %310 = sbr.rel (%p3376_p0) target bundleno = 2985 (0xba9), region = 44  ;;  %s313_s18 = scalar_lea.sflag (!%p3376_p0), [#allocation3], %s312_s11 }
  0x8f   : > { %s2540_s8 = smul.u32 (!%p3376_p0), 48, %s312_s11 }
  0x91   : > { %s316_s20 = scalar_lea.vmem (!%p3376_p0), [#allocation2], %s2540_s8 }
  0x93   : > { %2858 = dma.done.wait (%p3377_p11), %s313_s18, 768  }
  0x94   : > { %2860 = vsyncadd (%p3377_p11), %s313_s18, 4294966528  ;;  %s321_s19 = sand.u32 1, %s2955_s25   ;;  %s2122_s21 = sshll.u32 %s312_s11, 3 }
  0x95   : > { %s322_s29 = scalar_lea.sflag [#allocation5], %s321_s19  ;;  %s325_s13 = scalar_lea.vmem [#allocation4], %s2122_s21 }
  0x96   : > { %2862 = dma.done.wait (%p3377_p11), %s322_s29, 640  }
  0x97   : > { %2864 = vsyncadd (%p3377_p11), %s322_s29, 4294966656  ;;  %s2123_s27 = sshll.u32 %s312_s11, 5  ;;  %p3378_p12 = scmp.eq.s32.totalorder %s2955_s25, 0 }
  0x98   : > { %s3146_s3 = scalar_lea.vmem [#allocation6], %s2123_s27 }
  0x99   : > { %2866 = dma.done.wait (%p3378_p12), [#allocation8], 18176   ;;  %p3379_p13 = pmov %p3378_p12 }
  0x9a   : > { %p3380_p2 = pmov %p3378_p12 }
  0x9b   : > { %2868 = vsyncadd (%p3379_p13), [#allocation8], 4294949120 }
  0x9c   : > { %2870 = dma.done.wait (%p3380_p2), [#allocation11], 256   ;;  %p3381_p1 = pmov %p3380_p2 }
  0x9d   : > { %v394_v0 = vld [vmem:[%s325_s13] sm:$0xff]  ;;  %v3159_v2 = vld [vmem:[%s316_s20 + $0x8] sm:$0xff]  ;;  %v3161_v3 = vld [vmem:[%s316_s20 + $0x10] sm:$0xff]  ;;  %vm496_vm0 = vcmask 64512   ;;  %vm2898_vm1 = vmmov 0   ;;  %vm972_vm4 = vcmask 392192  }
  0x9e   : > { %2872 = vsyncadd (%p3381_p1), [#allocation11], 4294967040  ;;  %v3156_v1 = vld [vmem:[%s316_s20] sm:$0xff]  ;;  %2365 = vmatprep.subr.mxu0 %v394_v0  ;;  %2376 = vmatprep.subr.mxu1 %v394_v0  ;;  %v3165_v4 = vld [vmem:[%s316_s20 + $0x18] sm:$0xff]  ;;  %vm1205_vm9 = vcmask 261120   ;;  %vm1317_vm10 = vcmask 130048  }
  0x9f   : > { %2367 = vmatprep.mubr.f32.mxu0 %v3156_v1  ;;  %2366 = vmatpush3.xpose.msra.mxu0 %v394_v0  ;;  %v3167_v5 = vld [vmem:[%s316_s20 + $0x20] sm:$0xff]  ;;  %v3171_v6 = vld [vmem:[%s316_s20 + $0x28] sm:$0xff]  ;;  %p384_p3 = scmp.lt.s32.totalorder %s2955_s25, 3 }
  0xa0   : > { %2377 = vmatpush3.msra.mxu1 %v394_v0  ;;  %v707_v49 = vld [vmem:[#allocation9 + $0xf8] sm:$0xff]  ;;  %v706_v63 = vld [vmem:[#allocation9 + $0xf0] sm:$0xff] }
  0xa1   : > { %2161 = vmatprep.subr.mxu1 %v707_v49  ;;  %v691_v61 = vld [vmem:[#allocation9 + $0x78] sm:$0xff]  ;;  %v690_v0 = vld [vmem:[#allocation9 + $0x70] sm:$0xff]  ;;  %s3387_s25 = smov (!%p384_p3, %s2955_s25), 3 }
  0xa2   : > { %2368 = vmatmul.mubr.f32.vlgmr.msra.gmra.mxu0 %v3159_v2  ;;  %s2127_s26 = sshll.u32 %s3387_s25, 3 }
  0xa3   : > { %2370 = vmatprep.mubr.f32.mxu0 %v3161_v3  ;;  %s387_s24 = scalar_lea.vmem %s3348_s6, %s2127_s26 }
  0xa6   : > { %2371 = vmatmul.mubr.f32.gmra.mxu0 %v3165_v4 }
  0xa7   : > { %2373 = vmatprep.mubr.f32.mxu0 %v3167_v5 }
  0xaa   : > { %2374 = vmatmul.mubr.f32.gmra.mxu0 %v3171_v6 }
 0x162   : > { %v2369_v7 = vpop.f32.mrf.mxu0 }
 0x163   : > { %v500_v12 = vsel %vm496_vm0, %v2369_v7, -inf }
 0x164   : > { %v467_v8 = vpop.f32.mrf.mxu0 }
 0x165   : > { %v497_v9 = vsel %vm496_vm0, %v467_v8, -inf }
 0x166   : > { %498 = vmax.xlane.f32.xlu0 %v497_v9  ;;  %v2372_v10 = vpop.f32.mrf.mxu0 }
 0x167   : > { %v506_v16 = vsel %vm496_vm0, %v2372_v10, -inf }
 0x168   : > { %v477_v11 = vpop.f32.mrf.mxu0 }
 0x169   : > { %v503_v13 = vsel %vm496_vm0, %v477_v11, -inf }
 0x16a   : > { %501 = vmax.xlane.f32.xlu0 %v500_v12  ;;  %504 = vmax.xlane.f32.xlu1 %v503_v13  ;;  %v2375_v14 = vpop.f32.mrf.mxu0  ;;  %v704_v13 = vld [vmem:[#allocation9 + $0xe0] sm:$0xff] }
 0x16b   : > { %v512_v18 = vsel %vm496_vm0, %v2375_v14, -inf }
 0x16c   : > { %v487_v15 = vpop.f32.mrf.mxu0 }
 0x16d   : > { %v509_v17 = vsel %vm496_vm0, %v487_v15, -inf }
 0x16e   : > { %507 = vmax.xlane.f32.xlu1 %v506_v16  ;;  %510 = vmax.xlane.f32.xlu0 %v509_v17  ;;  %v703_v16 = vld [vmem:[#allocation9 + $0xd8] sm:$0xff] }
 0x172   : > { %513 = vmax.xlane.f32.xlu1 %v512_v18  ;;  %v687_v18 = vld [vmem:[#allocation9 + $0x58] sm:$0xff] }
 0x1ef   : > { %v499_v19 = vpop.xlane.xlu0 %498 }
 0x1f0   : > { %v515_v20 = vsub.f32 %v467_v8, %v499_v19  ;;  %v705_v8 = vld [vmem:[#allocation9 + $0xe8] sm:$0xff]  ;;  %v702_v19 = vld [vmem:[#allocation9 + $0xd0] sm:$0xff] }
 0x1f2   : > { %v521_v21 = vmul.f32 1.442695, %v515_v20  ;;  %v686_v20 = vld [vmem:[#allocation9 + $0x50] sm:$0xff] }
 0x1f3   : > { %v502_v22 = vpop.xlane.xlu0 %501  ;;  %v505_v23 = vpop.xlane.xlu1 %504 }
 0x1f4   : > { %2630 = vpow2.f32 %v521_v21  ;;  %v516_v24 = vsub.f32 %v2369_v7, %v502_v22  ;;  %v517_v25 = vsub.f32 %v477_v11, %v505_v23  ;;  %v689_v11 = vld [vmem:[#allocation9 + $0x68] sm:$0xff]  ;;  %v700_v23 = vld [vmem:[#allocation9 + $0xc0] sm:$0xff] }
 0x1f5   : > { %v701_v21 = vld [vmem:[#allocation9 + $0xc8] sm:$0xff] }
 0x1f6   : > { %v523_v26 = vmul.f32 1.442695, %v516_v24  ;;  %v525_v27 = vmul.f32 1.442695, %v517_v25  ;;  %v685_v22 = vld [vmem:[#allocation9 + $0x48] sm:$0xff]  ;;  %v684_v24 = vld [vmem:[#allocation9 + $0x40] sm:$0xff] }
 0x1f7   : > { %v508_v28 = vpop.xlane.xlu1 %507  ;;  %v511_v29 = vpop.xlane.xlu0 %510  ;;  %v699_v25 = vld [vmem:[#allocation9 + $0xb8] sm:$0xff] }
 0x1f8   : > { %2632 = vpow2.f32 %v523_v26  ;;  %v518_v30 = vsub.f32 %v2372_v10, %v508_v28  ;;  %v519_v31 = vsub.f32 %v487_v15, %v511_v29  ;;  %v683_v26 = vld [vmem:[#allocation9 + $0x38] sm:$0xff]  ;;  %v682_v28 = vld [vmem:[#allocation9 + $0x30] sm:$0xff]  ;;  %v697_v29 = vld [vmem:[#allocation9 + $0xa8] sm:$0xff] }
 0x1f9   : > { %2634 = vpow2.f32 %v525_v27  ;;  %v698_v27 = vld [vmem:[#allocation9 + $0xb0] sm:$0xff] }
 0x1fa   : > { %v527_v32 = vmul.f32 1.442695, %v518_v30  ;;  %v529_v33 = vmul.f32 1.442695, %v519_v31  ;;  %v681_v30 = vld [vmem:[#allocation9 + $0x28] sm:$0xff]  ;;  %v696_v31 = vld [vmem:[#allocation9 + $0xa0] sm:$0xff] }
 0x1fb   : > { %v514_v34 = vpop.xlane.xlu1 %513 }
 0x1fc   : > { %2636 = vpow2.f32 %v527_v32  ;;  %v520_v35 = vsub.f32 %v2375_v14, %v514_v34  ;;  %v688_v14 = vld [vmem:[#allocation9 + $0x60] sm:$0xff]  ;;  %v679_v34 = vld [vmem:[#allocation9 + $0x18] sm:$0xff] }
 0x1fd   : > { %2638 = vpow2.f32 %v529_v33  ;;  %v680_v32 = vld [vmem:[#allocation9 + $0x20] sm:$0xff]  ;;  %v695_v33 = vld [vmem:[#allocation9 + $0x98] sm:$0xff] }
 0x1fe   : > { %v531_v36 = vmul.f32 1.442695, %v520_v35  ;;  %v694_v35 = vld [vmem:[#allocation9 + $0x90] sm:$0xff] }
 0x200   : > { %2640 = vpow2.f32 %v531_v36  ;;  %v678_v36 = vld [vmem:[#allocation9 + $0x10] sm:$0xff] }
 0x201   : > { %v2631_v37 = vpop.eup %2630 }
 0x202   : > { %v533_v38 = vsel %vm496_vm0, %v2631_v37, 0.0 }
 0x203   : > { %534 = vadd.xlane.f32.xlu0 %v533_v38  ;;  %v677_v38 = vld [vmem:[#allocation9 + $0x8] sm:$0xff] }
 0x205   : > { %v2633_v39 = vpop.eup %2632 }
 0x206   : > { %v2635_v40 = vpop.eup %2634  ;;  %v536_v41 = vsel %vm496_vm0, %v2633_v39, 0.0 }
 0x207   : > { %537 = vadd.xlane.f32.xlu1 %v536_v41  ;;  %v539_v42 = vsel %vm496_vm0, %v2635_v40, 0.0 }
 0x208   : > { %540 = vadd.xlane.f32.xlu0 %v539_v42 }
 0x209   : > { %v2637_v43 = vpop.eup %2636 }
 0x20a   : > { %v2639_v44 = vpop.eup %2638  ;;  %v542_v45 = vsel %vm496_vm0, %v2637_v43, 0.0 }
 0x20b   : > { %543 = vadd.xlane.f32.xlu1 %v542_v45  ;;  %v545_v46 = vsel %vm496_vm0, %v2639_v44, 0.0 }
 0x20c   : > { %546 = vadd.xlane.f32.xlu0 %v545_v46 }
 0x20d   : > { %v2641_v47 = vpop.eup %2640 }
 0x20e   : > { %v548_v48 = vsel %vm496_vm0, %v2641_v47, 0.0 }
 0x20f   : > { %549 = vadd.xlane.f32.xlu1 %v548_v48 }
 0x28c   : > { %v535_v50 = vpop.xlane.xlu0 %534 }
 0x28d   : > { %2642 = vrcp.f32 %v535_v50 }
 0x290   : > { %v538_v51 = vpop.xlane.xlu1 %537 }
 0x291   : > { %2644 = vrcp.f32 %v538_v51  ;;  %v541_v52 = vpop.xlane.xlu0 %540 }
 0x292   : > { %2646 = vrcp.f32 %v541_v52 }
 0x294   : > { %v544_v53 = vpop.xlane.xlu1 %543 }
 0x295   : > { %2648 = vrcp.f32 %v544_v53  ;;  %v547_v54 = vpop.xlane.xlu0 %546 }
 0x296   : > { %2650 = vrcp.f32 %v547_v54 }
 0x298   : > { %v550_v55 = vpop.xlane.xlu1 %549 }
 0x299   : > { %2652 = vrcp.f32 %v550_v55  ;;  %v3206_v55 = vld [vmem:[#allocation10] sm:$0xff] }
 0x29a   : > { %v2643_v56 = vpop.eup %2642 }
 0x29b   : > { %v557_v57 = vmul.f32 %v2643_v56, %v2631_v37  ;;  %v693_v37 = vld [vmem:[#allocation9 + $0x88] sm:$0xff] }
 0x29d   : > { %2378 = vmatprep.mubr.msk.f32.mxu1 %vm496_vm0, %v557_v57 }
 0x29e   : > { %v2645_v58 = vpop.eup %2644 }
 0x29f   : > { %v2647_v59 = vpop.eup %2646  ;;  %v558_v60 = vmul.f32 %v2645_v58, %v2633_v39  ;;  %v692_v39 = vld [vmem:[#allocation9 + $0x80] sm:$0xff] }
 0x2a0   : > { %v559_v62 = vmul.f32 %v2647_v59, %v2635_v40  ;;  %v676_v40 = vld [vmem:[#allocation9] sm:$0xff] }
 0x2a1   : > { %2379 = vmatmul.mubr.msk.f32.vlgmr.msra.gmra.mxu1 %vm496_vm0, %v558_v60 }
 0x2a2   : > { %v2649_v7 = vpop.eup %2648  ;;  %2381 = vmatprep.mubr.msk.f32.mxu1 %vm496_vm0, %v559_v62  ;;  %2162 = vmatpush3.msra.mxu1 %v691_v61 }
 0x2a3   : > { %v2651_v9 = vpop.eup %2650  ;;  %v560_v10 = vmul.f32 %v2649_v7, %v2637_v43  ;;  %2163 = vmatprep.subr.mxu1 %v706_v63 }
 0x2a4   : > { %v561_v12 = vmul.f32 %v2651_v9, %v2639_v44  ;;  %2164 = vmatpush3.msra.mxu1 %v690_v0 }
 0x2a5   : > { %2382 = vmatmul.mubr.msk.f32.gmra.mxu1 %vm496_vm0, %v560_v10  ;;  %2165 = vmatprep.subr.mxu1 %v705_v8 }
 0x2a6   : > { %v2653_v15 = vpop.eup %2652  ;;  %2384 = vmatprep.mubr.msk.f32.mxu1 %vm496_vm0, %v561_v12  ;;  %2166 = vmatpush3.msra.mxu1 %v689_v11 }
 0x2a7   : > { %v562_v17 = vmul.f32 %v2653_v15, %v2641_v47  ;;  %2167 = vmatprep.subr.mxu1 %v704_v13  ;;  %v2897_v47 = vmov 0.0  }
 0x2a8   : > { %2168 = vmatpush3.msra.mxu1 %v688_v14  ;;  %2387 = vmatprep.subr.mxu0 %v2897_v47 }
 0x2a9   : > { %2385 = vmatmul.mubr.msk.f32.gmra.mxu1 %vm496_vm0, %v562_v17  ;;  %2169 = vmatprep.subr.mxu1 %v703_v16 }
 0x2aa   : > { %2170 = vmatpush3.msra.mxu1 %v687_v18  ;;  %2399 = vmatprep.mubr.msk.f32.mxu0 %vm2898_vm1, %v2897_v47 }
 0x2ab   : > { %2171 = vmatprep.subr.mxu1 %v702_v19  ;;  %v814_v19 = vrot.slane %v3206_v55, 1 }
 0x2ac   : > { %2172 = vmatpush3.msra.mxu1 %v686_v20  ;;  %v3218_v20 = vld [vmem:[%s3146_s3 + $0x18] sm:$0xff] }
 0x2ad   : > { %2173 = vmatprep.subr.mxu1 %v701_v21  ;;  %v3225_v21 = vld [vmem:[%s3146_s3 + $0x10] sm:$0xff] }
 0x2ae   : > { %2174 = vmatpush3.msra.mxu1 %v685_v22  ;;  %v3230_v22 = vld [vmem:[%s3146_s3 + $0x8] sm:$0xff] }
 0x2af   : > { %2175 = vmatprep.subr.mxu1 %v700_v23  ;;  %v3235_v23 = vld [vmem:[%s3146_s3] sm:$0xff] }
 0x2b0   : > { %2176 = vmatpush3.msra.mxu1 %v684_v24  ;;  %v886_v24 = vrot.slane %v3206_v55, 3 }
 0x2b1   : > { %2177 = vmatprep.subr.mxu1 %v699_v25 }
 0x2b2   : > { %2178 = vmatpush3.msra.mxu1 %v683_v26  ;;  %v3241_v26 = vld [vmem:[#allocation7 + $0x8] sm:$0xff] }
 0x2b3   : > { %2179 = vmatprep.subr.mxu1 %v698_v27  ;;  %v3243_v27 = vld [vmem:[#allocation7] sm:$0xff]  ;;  %vm965_vm2 = vcmp.gt.f32.partialorder %v3241_v26, 0.0 }
 0x2b4   : > { %2180 = vmatpush3.msra.mxu1 %v682_v28  ;;  %v3245_v28 = vld [vmem:[#allocation7 + $0x18] sm:$0xff]  ;;  %vm964_vm3 = vcmp.gt.f32.partialorder %v3243_v27, 0.0 }
 0x2b5   : > { %2181 = vmatprep.subr.mxu1 %v697_v29  ;;  %v3247_v29 = vld [vmem:[#allocation7 + $0x10] sm:$0xff]  ;;  %vm1081_vm5 = vcmp.gt.f32.partialorder %v3245_v28, 0.0 }
 0x2b6   : > { %2182 = vmatpush3.msra.mxu1 %v681_v30  ;;  %vm1080_vm6 = vcmp.gt.f32.partialorder %v3247_v29, 0.0 }
 0x2b7   : > { %2183 = vmatprep.subr.mxu1 %v696_v31 }
 0x2b8   : > { %2184 = vmatpush3.msra.mxu1 %v680_v32 }
 0x2b9   : > { %2185 = vmatprep.subr.mxu1 %v695_v33 }
 0x2ba   : > { %2186 = vmatpush3.msra.mxu1 %v679_v34 }
 0x2bb   : > { %2187 = vmatprep.subr.mxu1 %v694_v35 }
 0x2bc   : > { %2188 = vmatpush3.msra.mxu1 %v678_v36 }
 0x2bd   : > { %2189 = vmatprep.subr.mxu1 %v693_v37 }
 0x2be   : > { %2190 = vmatpush3.msra.mxu1 %v677_v38 }
 0x2bf   : > { %2191 = vmatprep.subr.mxu1 %v692_v39 }
 0x2c0   : > { %2192 = vmatpush3.msra.mxu1 %v676_v40 }
 0x361   : > { %v2380_v41 = vpop.f32.mrf.mxu1 }
 0x363   : > { %v647_v42 = vpop.f32.mrf.mxu1 }
 0x364   : > { %776 = vmatprep.mubr.f32.mxu1 %v647_v42  ;;  %v3260_v42 = vld [vmem:[#allocation7 + $0x28] sm:$0xff] }
 0x365   : > { %v2383_v43 = vpop.f32.mrf.mxu1  ;;  %777 = vmatmul.mubr.f32.vlgmr.msra.gmra.mxu1 %v3156_v1  ;;  %vm1198_vm7 = vcmp.gt.f32.partialorder %v3260_v42, 0.0 }
 0x366   : > { %781 = vmatprep.mubr.f32.mxu1 %v2380_v41 }
 0x367   : > { %v657_v44 = vpop.f32.mrf.mxu1 }
 0x369   : > { %782 = vmatmul.mubr.f32.gmra.mxu1 %v3159_v2  ;;  %v2386_v45 = vpop.f32.mrf.mxu1 }
 0x36a   : > { %786 = vmatprep.mubr.f32.mxu1 %v657_v44 }
 0x36b   : > { %v667_v46 = vpop.f32.mrf.mxu1 }
 0x36d   : > { %787 = vmatmul.mubr.f32.gmra.mxu1 %v3161_v3 }
 0x36e   : > { %791 = vmatprep.mubr.f32.mxu1 %v2383_v43  ;;  %v3262_v43 = vld [vmem:[#allocation7 + $0x20] sm:$0xff] }
 0x36f   : > { %vm1197_vm8 = vcmp.gt.f32.partialorder %v3262_v43, 0.0 }
 0x371   : > { %792 = vmatmul.mubr.f32.gmra.mxu1 %v3165_v4  ;;  %v708_v4 = vlaneseq }
 0x372   : > { %796 = vmatprep.mubr.f32.mxu1 %v667_v46 }
 0x375   : > { %797 = vmatmul.mubr.f32.gmra.mxu1 %v3167_v5  ;;  %v3201_v5 = vshrl.u32 %v708_v4, 7 }
 0x376   : > { %801 = vmatprep.mubr.f32.mxu1 %v2386_v45 }
 0x377   : > { %v3204_v54 = vsub.s32 0, %v3201_v5  ;;  %v1084_v25 = vsub.s32 1, %v3201_v5 }
 0x379   : > { %802 = vmatmul.mubr.f32.gmra.mxu1 %v3171_v6  ;;  %v711_v59 = vrot.slane %v3206_v55, %v3204_v54 }
 0x425   : > { %v2193_v1 = vpop.f32.mrf.mxu1 }
 0x427   : > { %v2194_v2 = vpop.f32.mrf.mxu1 }
 0x428   : > { %v2195_v10 = vadd.f32 %v2194_v2, %v2193_v1 }
 0x429   : > { %v2196_v3 = vpop.f32.mrf.mxu1 }
 0x42a   : > { %v779_v15 = vadd.f32 %v2195_v10, %v711_v59 }
 0x42b   : > { %v2197_v48 = vpop.f32.mrf.mxu1 }
 0x42c   : > { %v2198_v7 = vadd.f32 %v2197_v48, %v2196_v3  ;;  %v807_v18 = vmax.f32 %v779_v15, 0.0 }
 0x42d   : > { %v2199_v49 = vpop.f32.mrf.mxu1 }
 0x42e   : > { %v784_v13 = vadd.f32 %v2198_v7, %v711_v59 }
 0x42f   : > { %v2200_v50 = vpop.f32.mrf.mxu1 }
 0x430   : > { %v2201_v62 = vadd.f32 %v2200_v50, %v2199_v49  ;;  %v808_v17 = vmax.f32 %v784_v13, 0.0 }
 0x431   : > { %v2202_v51 = vpop.f32.mrf.mxu1 }
 0x432   : > { %v789_v11 = vadd.f32 %v2201_v62, %v711_v59 }
 0x433   : > { %v2203_v52 = vpop.f32.mrf.mxu1 }
 0x434   : > { %v2204_v60 = vadd.f32 %v2203_v52, %v2202_v51  ;;  %v809_v16 = vmax.f32 %v789_v11, 0.0 }
 0x435   : > { %v2205_v53 = vpop.f32.mrf.mxu1 }
 0x436   : > { %v794_v8 = vadd.f32 %v2204_v60, %v711_v59 }
 0x437   : > { %v2206_v6 = vpop.f32.mrf.mxu1 }
 0x438   : > { %v2207_v57 = vadd.f32 %v2206_v6, %v2205_v53  ;;  %v810_v14 = vmax.f32 %v794_v8, 0.0 }
 0x439   : > { %v2208_v56 = vpop.f32.mrf.mxu1 }
 0x43a   : > { %v799_v63 = vadd.f32 %v2207_v57, %v711_v59 }
 0x43b   : > { %v2209_v58 = vpop.f32.mrf.mxu1 }
 0x43c   : > { %v2210_v61 = vadd.f32 %v2209_v58, %v2208_v56  ;;  %v811_v12 = vmax.f32 %v799_v63, 0.0 }
 0x43e   : > { %v804_v0 = vadd.f32 %v2210_v61, %v711_v59 }
 0x440   : > { %v812_v9 = vmax.f32 %v804_v0, 0.0 }
 0x442   : > { %2388 = vmatpush3.xpose.msra.mxu0 %v812_v9  ;;  %2428 = vmatprep.subr.mxu1 %v812_v9 }
 0x443   : > { %2429 = vmatpush3.msra.mxu1 %v812_v9  ;;  %2389 = vmatprep.subr.mxu0 %v2897_v47 }
 0x444   : > { %2430 = vmatprep.subr.mxu1 %v811_v12 }
 0x445   : > { %2431 = vmatpush3.msra.mxu1 %v811_v12 }
 0x446   : > { %2390 = vmatpush3.xpose.msra.mxu0 %v811_v12  ;;  %2432 = vmatprep.subr.mxu1 %v810_v14 }
 0x447   : > { %2433 = vmatpush3.msra.mxu1 %v810_v14  ;;  %2391 = vmatprep.subr.mxu0 %v2897_v47 }
 0x448   : > { %2434 = vmatprep.subr.mxu1 %v809_v16 }
 0x449   : > { %2435 = vmatpush3.msra.mxu1 %v809_v16 }
 0x44a   : > { %2392 = vmatpush3.xpose.msra.mxu0 %v810_v14  ;;  %2436 = vmatprep.subr.mxu1 %v808_v17 }
 0x44b   : > { %2437 = vmatpush3.msra.mxu1 %v808_v17  ;;  %2393 = vmatprep.subr.mxu0 %v2897_v47 }
 0x44c   : > { %2438 = vmatprep.subr.mxu1 %v807_v18 }
 0x44d   : > { %2439 = vmatpush3.msra.mxu1 %v807_v18 }
 0x44e   : > { %2394 = vmatpush3.xpose.msra.mxu0 %v809_v16 }
 0x44f   : > { %2395 = vmatprep.subr.mxu0 %v2897_v47 }
 0x452   : > { %2396 = vmatpush3.xpose.msra.mxu0 %v808_v17 }
 0x453   : > { %2397 = vmatprep.subr.mxu0 %v2897_v47 }
 0x456   : > { %2398 = vmatpush3.xpose.msra.mxu0 %v807_v18 }
 0x457   : > { %2402 = vmatprep.subr.mxu0 %v2897_v47 }
 0x459   : > { %2400 = vmatmul.mubr.f32.vlgmr.msra.gmra.mxu0 %v814_v19 }
 0x45a   : > { %2403 = vmatpush3.xpose.msra.mxu0 %v3218_v20  ;;  %2410 = vmatprep.mubr.msk.f32.mxu0 %vm2898_vm1, %v2897_v47 }
 0x45b   : > { %2404 = vmatprep.subr.mxu0 %v2897_v47 }
 0x45e   : > { %2405 = vmatpush3.xpose.msra.mxu0 %v3225_v21 }
 0x45f   : > { %2406 = vmatprep.subr.mxu0 %v2897_v47 }
 0x462   : > { %2407 = vmatpush3.xpose.msra.mxu0 %v3230_v22 }
 0x463   : > { %2408 = vmatprep.subr.mxu0 %v2897_v47 }
 0x466   : > { %2409 = vmatpush3.xpose.msra.mxu0 %v3235_v23 }
 0x467   : > { %2413 = vmatprep.subr.mxu0 %v812_v9 }
 0x469   : > { %2411 = vmatmul.mubr.f32.vlgmr.msra.gmra.mxu0 %v886_v24 }
 0x46a   : > { %2414 = vmatpush3.msra.mxu0 %v812_v9 }
 0x46b   : > { %2415 = vmatprep.subr.mxu0 %v811_v12 }
 0x46c   : > { %2416 = vmatpush3.msra.mxu0 %v811_v12 }
 0x46d   : > { %2417 = vmatprep.subr.mxu0 %v810_v14 }
 0x46e   : > { %2418 = vmatpush3.msra.mxu0 %v810_v14 }
 0x46f   : > { %2419 = vmatprep.subr.mxu0 %v809_v16 }
 0x470   : > { %2420 = vmatpush3.msra.mxu0 %v809_v16 }
 0x471   : > { %2421 = vmatprep.subr.mxu0 %v808_v17 }
 0x472   : > { %2422 = vmatpush3.msra.mxu0 %v808_v17 }
 0x473   : > { %2423 = vmatprep.subr.mxu0 %v807_v18 }
 0x474   : > { %2424 = vmatpush3.msra.mxu0 %v807_v18 }
 0x475   : > { %2443 = vmatprep.subr.mxu0 %v3218_v20 }
 0x519   : > { %v882_v30 = vpop.f32.mrf.mxu0 }
 0x51a   : > { %v969_v31 = vrot.slane %v882_v30, %v3204_v54  ;;  %v1085_v32 = vrot.slane %v882_v30, %v1084_v25 }
 0x51b   : > { %v2401_v33 = vpop.f32.mrf.mxu0 }
 0x51c   : > { %v971_v34 = vsel %vm965_vm2, %v969_v31, -1e+30  ;;  %v970_v35 = vsel %vm964_vm3, %v969_v31, -1e+30  ;;  %v1087_v38 = vsel %vm1081_vm5, %v1085_v32, -1e+30 }
 0x51d   : > { %v976_v36 = vsel %vm972_vm4, %v971_v34, -inf  ;;  %v973_v37 = vsel %vm972_vm4, %v970_v35, -inf  ;;  %v1086_v39 = vsel %vm1080_vm6, %v1085_v32, -1e+30  ;;  %v1091_v40 = vsel %vm972_vm4, %v1087_v38, -inf }
 0x51e   : > { %977 = vmax.xlane.f32.xlu1 %v976_v36  ;;  %974 = vmax.xlane.f32.xlu0 %v973_v37  ;;  %v1088_v41 = vsel %vm972_vm4, %v1086_v39, -inf }
 0x522   : > { %1092 = vmax.xlane.f32.xlu1 %v1091_v40  ;;  %1089 = vmax.xlane.f32.xlu0 %v1088_v41 }
 0x529   : > { %v954_v44 = vpop.f32.mrf.mxu0 }
 0x52a   : > { %v1202_v45 = vrot.slane %v954_v44, %v3204_v54 }
 0x52b   : > { %v2412_v46 = vpop.f32.mrf.mxu0 }
 0x52c   : > { %v1204_v47 = vsel %vm1198_vm7, %v1202_v45, -1e+30  ;;  %v1203_v1 = vsel %vm1197_vm8, %v1202_v45, -1e+30 }
 0x52d   : > { %v1209_v2 = vsel %vm1205_vm9, %v1204_v47, -inf  ;;  %v1206_v3 = vsel %vm1205_vm9, %v1203_v1, -inf }
 0x52e   : > { %1210 = vmax.xlane.f32.xlu1 %v1209_v2  ;;  %1207 = vmax.xlane.f32.xlu0 %v1206_v3 }
 0x5a7   : > { %v978_v48 = vpop.xlane.xlu1 %977  ;;  %v975_v49 = vpop.xlane.xlu0 %974 }
 0x5a8   : > { %v980_v50 = vsub.f32 %v971_v34, %v978_v48  ;;  %v979_v4 = vsub.f32 %v970_v35, %v975_v49 }
 0x5aa   : > { %v983_v51 = vmul.f32 1.442695, %v980_v50  ;;  %v981_v52 = vmul.f32 1.442695, %v979_v4 }
 0x5ab   : > { %v1093_v53 = vpop.xlane.xlu1 %1092  ;;  %v1090_v6 = vpop.xlane.xlu0 %1089 }
 0x5ac   : > { %2654 = vpow2.f32 %v983_v51  ;;  %v1095_v56 = vsub.f32 %v1087_v38, %v1093_v53  ;;  %v1094_v57 = vsub.f32 %v1086_v39, %v1090_v6 }
 0x5ad   : > { %2656 = vpow2.f32 %v981_v52 }
 0x5ae   : > { %v1098_v58 = vmul.f32 1.442695, %v1095_v56  ;;  %v1096_v59 = vmul.f32 1.442695, %v1094_v57 }
 0x5b0   : > { %2658 = vpow2.f32 %v1098_v58 }
 0x5b1   : > { %2660 = vpow2.f32 %v1096_v59  ;;  %v3300_v59 = vld [vmem:[#allocation7 + $0x38] sm:$0xff] }
 0x5b7   : > { %v1211_v60 = vpop.xlane.xlu1 %1210  ;;  %v1208_v61 = vpop.xlane.xlu0 %1207 }
 0x5b8   : > { %v1213_v62 = vsub.f32 %v1204_v47, %v1211_v60  ;;  %v1212_v63 = vsub.f32 %v1203_v1, %v1208_v61  ;;  %v1430_v60 = vld [vmem:[#allocation9 + $0x1f8] sm:$0xff] }
 0x5b9   : > { %v2655_v0 = vpop.eup %2654  ;;  %v1414_v61 = vld [vmem:[#allocation9 + $0x178] sm:$0xff] }
 0x5ba   : > { %v2657_v7 = vpop.eup %2656  ;;  %v1216_v8 = vmul.f32 1.442695, %v1213_v62  ;;  %v1214_v9 = vmul.f32 1.442695, %v1212_v63  ;;  %v986_v10 = vmul.f32 %v2655_v0, %v3241_v26  ;;  %v1429_v62 = vld [vmem:[#allocation9 + $0x1f0] sm:$0xff]  ;;  %v1428_v0 = vld [vmem:[#allocation9 + $0x1e8] sm:$0xff] }
 0x5bb   : > { %v985_v11 = vmul.f32 %v2657_v7, %v3243_v27  ;;  %v1413_v63 = vld [vmem:[#allocation9 + $0x170] sm:$0xff]  ;;  %v1412_v7 = vld [vmem:[#allocation9 + $0x168] sm:$0xff] }
 0x5bc   : > { %2662 = vpow2.f32 %v1216_v8  ;;  %v990_v12 = vsel %vm972_vm4, %v986_v10, 0.0  ;;  %v1427_v8 = vld [vmem:[#allocation9 + $0x1e0] sm:$0xff] }
 0x5bd   : > { %v2659_v13 = vpop.eup %2658  ;;  %2664 = vpow2.f32 %v1214_v9  ;;  %2425 = vmatprep.mubr.msk.f32.mxu0 %vm972_vm4, %v985_v11  ;;  %991 = vadd.xlane.f32.xlu0 %v990_v12  ;;  %v987_v18 = vsel %vm972_vm4, %v985_v11, 0.0  ;;  %v1411_v9 = vld [vmem:[#allocation9 + $0x160] sm:$0xff]  ;;  %v1410_v11 = vld [vmem:[#allocation9 + $0x158] sm:$0xff]  ;;  %v1425_v12 = vld [vmem:[#allocation9 + $0x1d0] sm:$0xff] }
 0x5be   : > { %v2661_v14 = vpop.eup %2660  ;;  %v1101_v15 = vmul.f32 %v2659_v13, %v3245_v28  ;;  %2426 = vmatmul.mubr.msk.f32.vlgmr.msra.gmra.mxu0 %vm972_vm4, %v986_v10  ;;  %v1426_v10 = vld [vmem:[#allocation9 + $0x1d8] sm:$0xff]  ;;  %v1409_v13 = vld [vmem:[#allocation9 + $0x150] sm:$0xff] }
 0x5bf   : > { %v1100_v16 = vmul.f32 %v2661_v14, %v3247_v29  ;;  %2444 = vmatpush3.msra.mxu0 %v3218_v20  ;;  %v1424_v14 = vld [vmem:[#allocation9 + $0x1c8] sm:$0xff] }
 0x5c0   : > { %v1105_v17 = vsel %vm972_vm4, %v1101_v15, 0.0  ;;  %2445 = vmatprep.subr.mxu0 %v3225_v21 }
 0x5c1   : > { %2440 = vmatprep.mubr.msk.f32.mxu1 %vm972_vm4, %v1100_v16  ;;  %1106 = vadd.xlane.f32.xlu1 %v1105_v17  ;;  %v1102_v19 = vsel %vm972_vm4, %v1100_v16, 0.0  ;;  %v1423_v16 = vld [vmem:[#allocation9 + $0x1c0] sm:$0xff] }
 0x5c2   : > { %2441 = vmatmul.mubr.msk.f32.vlgmr.msra.gmra.mxu1 %vm972_vm4, %v1101_v15  ;;  %988 = vadd.xlane.f32.xlu0 %v987_v18  ;;  %v1408_v15 = vld [vmem:[#allocation9 + $0x148] sm:$0xff]  ;;  %v1407_v17 = vld [vmem:[#allocation9 + $0x140] sm:$0xff]  ;;  %v1422_v18 = vld [vmem:[#allocation9 + $0x1b8] sm:$0xff] }
 0x5c3   : > { %2446 = vmatpush3.msra.mxu0 %v3225_v21 }
 0x5c4   : > { %2447 = vmatprep.subr.mxu0 %v3230_v22 }
 0x5c5   : > { %1103 = vadd.xlane.f32.xlu1 %v1102_v19  ;;  %2448 = vmatpush3.msra.mxu0 %v3230_v22  ;;  %v1315_v22 = vld [vmem:[#allocation7 + $0x30] sm:$0xff]  ;;  %v1406_v19 = vld [vmem:[#allocation9 + $0x138] sm:$0xff] }
 0x5c6   : > { %2449 = vmatprep.subr.mxu0 %v3235_v23  ;;  %2458 = vmatprep.mubr.msk.f32.mxu1 %vm1317_vm10, %v1315_v22 }
 0x5c7   : > { %2450 = vmatpush3.msra.mxu0 %v3235_v23 }
 0x5c9   : > { %v2663_v20 = vpop.eup %2662 }
 0x5ca   : > { %v2665_v24 = vpop.eup %2664  ;;  %v1219_v26 = vmul.f32 %v2663_v20, %v3260_v42  ;;  %v1421_v20 = vld [vmem:[#allocation9 + $0x1b0] sm:$0xff] }
 0x5cb   : > { %v1218_v27 = vmul.f32 %v2665_v24, %v3262_v43  ;;  %v1405_v24 = vld [vmem:[#allocation9 + $0x130] sm:$0xff] }
 0x5cc   : > { %v1223_v28 = vsel %vm1205_vm9, %v1219_v26, 0.0 }
 0x5cd   : > { %2451 = vmatprep.mubr.msk.f32.mxu0 %vm1205_vm9, %v1218_v27  ;;  %1224 = vadd.xlane.f32.xlu0 %v1223_v28  ;;  %v1220_v21 = vsel %vm1205_vm9, %v1218_v27, 0.0  ;;  %v1404_v27 = vld [vmem:[#allocation9 + $0x128] sm:$0xff]  ;;  %v1419_v28 = vld [vmem:[#allocation9 + $0x1a0] sm:$0xff] }
 0x5ce   : > { %2452 = vmatmul.mubr.msk.f32.vlgmr.msra.gmra.mxu0 %vm1205_vm9, %v1219_v26  ;;  %1221 = vadd.xlane.f32.xlu1 %v1220_v21  ;;  %v1420_v26 = vld [vmem:[#allocation9 + $0x1a8] sm:$0xff]  ;;  %v1403_v21 = vld [vmem:[#allocation9 + $0x120] sm:$0xff] }
 0x5cf   : > { %2465 = vmatprep.mubr.msk.f32.mxu0 %vm1317_vm10, %v1315_v22  ;;  %v1418_v22 = vld [vmem:[#allocation9 + $0x198] sm:$0xff] }
 0x646   : > { %v992_v23 = vpop.xlane.xlu0 %991 }
 0x647   : > { %v994_v33 = vadd.f32 1e-09, %v992_v23  ;;  %v1402_v23 = vld [vmem:[#allocation9 + $0x118] sm:$0xff] }
 0x64a   : > { %v1107_v29 = vpop.xlane.xlu1 %1106 }
 0x64b   : > { %v989_v30 = vpop.xlane.xlu0 %988  ;;  %v1109_v32 = vadd.f32 1e-09, %v1107_v29  ;;  %v1417_v29 = vld [vmem:[#allocation9 + $0x190] sm:$0xff] }
 0x64c   : > { %v993_v36 = vadd.f32 1e-09, %v989_v30  ;;  %v1401_v30 = vld [vmem:[#allocation9 + $0x110] sm:$0xff] }
 0x64d   : > { %2666 = vrcp.f32 %v1109_v32  ;;  %v1400_v32 = vld [vmem:[#allocation9 + $0x108] sm:$0xff] }
 0x64e   : > { %v1104_v31 = vpop.xlane.xlu1 %1103  ;;  %2668 = vrcp.f32 %v994_v33  ;;  %v1415_v33 = vld [vmem:[#allocation9 + $0x180] sm:$0xff] }
 0x64f   : > { %v1108_v35 = vadd.f32 1e-09, %v1104_v31  ;;  %v1416_v31 = vld [vmem:[#allocation9 + $0x188] sm:$0xff] }
 0x651   : > { %2670 = vrcp.f32 %v1108_v35 }
 0x652   : > { %2672 = vrcp.f32 %v993_v36 }
 0x656   : > { %v1225_v34 = vpop.xlane.xlu0 %1224 }
 0x657   : > { %v1222_v37 = vpop.xlane.xlu1 %1221  ;;  %v1227_v38 = vadd.f32 1e-09, %v1225_v34  ;;  %v1399_v34 = vld [vmem:[#allocation9 + $0x100] sm:$0xff] }
 0x658   : > { %v1226_v39 = vadd.f32 1e-09, %v1222_v37 }
 0x659   : > { %2674 = vrcp.f32 %v1227_v38  ;;  %v1433_v38 = vsub.s32 4, %v3201_v5 }
 0x65a   : > { %2676 = vrcp.f32 %v1226_v39  ;;  %v2667_v42 = vpop.eup %2666 }
 0x65b   : > { %v2669_v44 = vpop.eup %2668 }
 0x65e   : > { %v2671_v46 = vpop.eup %2670 }
 0x65f   : > { %v2673_v1 = vpop.eup %2672 }
 0x666   : > { %v2675_v48 = vpop.eup %2674 }
 0x667   : > { %v2677_v52 = vpop.eup %2676 }
 0x67e   : > { %v2427_v41 = vpop.f32.mrf.mxu0 }
 0x67f   : > { %v1079_v2 = vmul.f32 %v2669_v44, %v2427_v41  ;;  %v1434_v41 = vrot.slane %v3206_v55, %v1433_v38  ;;  %v1823_v38 = vld [vmem:[#allocation9 + $0x3d0] sm:$0xff] }
 0x680   : > { %v1067_v47 = vpop.f32.mrf.mxu0 }
 0x681   : > { %v1078_v50 = vmul.f32 %v2673_v1, %v1067_v47 }
 0x682   : > { %v2442_v40 = vpop.f32.mrf.mxu1 }
 0x683   : > { %v1194_v45 = vmul.f32 %v2667_v42, %v2442_v40 }
 0x684   : > { %v1182_v43 = vpop.f32.mrf.mxu1 }
 0x685   : > { %v1193_v3 = vmul.f32 %v2671_v46, %v1182_v43  ;;  %v1196_v4 = vadd.f32 %v1194_v45, %v1079_v2  ;;  %v1618_v2 = vld [vmem:[#allocation9 + $0x2f8] sm:$0xff] }
 0x687   : > { %v1195_v6 = vadd.f32 %v1193_v3, %v1078_v50  ;;  %v1602_v3 = vld [vmem:[#allocation9 + $0x278] sm:$0xff]  ;;  %v1616_v50 = vld [vmem:[#allocation9 + $0x2e8] sm:$0xff] }
 0x68e   : > { %v2453_v49 = vpop.f32.mrf.mxu0 }
 0x68f   : > { %v1312_v51 = vmul.f32 %v2675_v48, %v2453_v49  ;;  %v1617_v48 = vld [vmem:[#allocation9 + $0x2f0] sm:$0xff] }
 0x690   : > { %v1300_v53 = vpop.f32.mrf.mxu0  ;;  %v1601_v49 = vld [vmem:[#allocation9 + $0x270] sm:$0xff] }
 0x691   : > { %v3296_v56 = vadd.f32 %v1312_v51, %v1196_v4  ;;  %v1311_v57 = vmul.f32 %v2677_v52, %v1300_v53  ;;  %v1600_v4 = vld [vmem:[#allocation9 + $0x268] sm:$0xff]  ;;  %v1615_v51 = vld [vmem:[#allocation9 + $0x2e0] sm:$0xff]  ;;  %v1614_v53 = vld [vmem:[#allocation9 + $0x2d8] sm:$0xff] }
 0x692   : > { %v1599_v52 = vld [vmem:[#allocation9 + $0x260] sm:$0xff] }
 0x693   : > { %v1313_v58 = vadd.f32 %v1311_v57, %v1195_v6  ;;  %2454 = vmatprep.subr.mxu1 %v3296_v56  ;;  %v1598_v6 = vld [vmem:[#allocation9 + $0x258] sm:$0xff]  ;;  %v1597_v57 = vld [vmem:[#allocation9 + $0x250] sm:$0xff] }
 0x694   : > { %2455 = vmatpush3.msra.mxu1 %v3296_v56 }
 0x695   : > { %2456 = vmatprep.subr.mxu1 %v1313_v58 }
 0x696   : > { %2457 = vmatpush3.msra.mxu1 %v1313_v58 }
 0x697   : > { %2459 = vmatmul.mubr.msk.f32.vlgmr.msra.gmra.mxu1 %vm1317_vm10, %v3300_v59  ;;  %2249 = vmatprep.subr.mxu1 %v1430_v60  ;;  %v1611_v60 = vld [vmem:[#allocation9 + $0x2c0] sm:$0xff] }
 0x698   : > { %1499 = vmatprep.mubr.f32.mxu1 %v1313_v58  ;;  %2250 = vmatpush3.msra.mxu1 %v1414_v61  ;;  %v1612_v58 = vld [vmem:[#allocation9 + $0x2c8] sm:$0xff]  ;;  %v1595_v61 = vld [vmem:[#allocation9 + $0x240] sm:$0xff] }
 0x699   : > { %2251 = vmatprep.subr.mxu1 %v1429_v62  ;;  %v1610_v62 = vld [vmem:[#allocation9 + $0x2b8] sm:$0xff] }
 0x69a   : > { %2252 = vmatpush3.msra.mxu1 %v1413_v63  ;;  %v1594_v63 = vld [vmem:[#allocation9 + $0x238] sm:$0xff] }
 0x69b   : > { %2253 = vmatprep.subr.mxu1 %v1428_v0  ;;  %v1609_v0 = vld [vmem:[#allocation9 + $0x2b0] sm:$0xff] }
 0x69c   : > { %2254 = vmatpush3.msra.mxu1 %v1412_v7  ;;  %v1593_v7 = vld [vmem:[#allocation9 + $0x230] sm:$0xff] }
 0x69d   : > { %2255 = vmatprep.subr.mxu1 %v1427_v8  ;;  %v1608_v8 = vld [vmem:[#allocation9 + $0x2a8] sm:$0xff] }
 0x69e   : > { %2256 = vmatpush3.msra.mxu1 %v1411_v9  ;;  %v1592_v9 = vld [vmem:[#allocation9 + $0x228] sm:$0xff] }
 0x69f   : > { %2257 = vmatprep.subr.mxu1 %v1426_v10  ;;  %v1607_v10 = vld [vmem:[#allocation9 + $0x2a0] sm:$0xff] }
 0x6a0   : > { %2258 = vmatpush3.msra.mxu1 %v1410_v11  ;;  %v1591_v11 = vld [vmem:[#allocation9 + $0x220] sm:$0xff] }
 0x6a1   : > { %2259 = vmatprep.subr.mxu1 %v1425_v12  ;;  %v1606_v12 = vld [vmem:[#allocation9 + $0x298] sm:$0xff] }
 0x6a2   : > { %2260 = vmatpush3.msra.mxu1 %v1409_v13  ;;  %v1590_v13 = vld [vmem:[#allocation9 + $0x218] sm:$0xff] }
 0x6a3   : > { %2261 = vmatprep.subr.mxu1 %v1424_v14  ;;  %v1605_v14 = vld [vmem:[#allocation9 + $0x290] sm:$0xff] }
 0x6a4   : > { %2262 = vmatpush3.msra.mxu1 %v1408_v15  ;;  %v1589_v15 = vld [vmem:[#allocation9 + $0x210] sm:$0xff] }
 0x6a5   : > { %2263 = vmatprep.subr.mxu1 %v1423_v16  ;;  %v1604_v16 = vld [vmem:[#allocation9 + $0x288] sm:$0xff] }
 0x6a6   : > { %2264 = vmatpush3.msra.mxu1 %v1407_v17  ;;  %v1588_v17 = vld [vmem:[#allocation9 + $0x208] sm:$0xff] }
 0x6a7   : > { %2265 = vmatprep.subr.mxu1 %v1422_v18  ;;  %v1603_v18 = vld [vmem:[#allocation9 + $0x280] sm:$0xff] }
 0x6a8   : > { %2266 = vmatpush3.msra.mxu1 %v1406_v19  ;;  %v1587_v19 = vld [vmem:[#allocation9 + $0x200] sm:$0xff] }
 0x6a9   : > { %2267 = vmatprep.subr.mxu1 %v1421_v20  ;;  %v1715_v20 = vld [vmem:[#allocation9 + $0x378] sm:$0xff] }
 0x6aa   : > { %2268 = vmatpush3.msra.mxu1 %v1405_v24  ;;  %v1828_v24 = vld [vmem:[#allocation9 + $0x3f8] sm:$0xff] }
 0x6ab   : > { %2269 = vmatprep.subr.mxu1 %v1420_v26  ;;  %v1714_v26 = vld [vmem:[#allocation9 + $0x370] sm:$0xff] }
 0x6ac   : > { %2270 = vmatpush3.msra.mxu1 %v1404_v27  ;;  %v1713_v27 = vld [vmem:[#allocation9 + $0x368] sm:$0xff] }
 0x6ad   : > { %2271 = vmatprep.subr.mxu1 %v1419_v28  ;;  %v1712_v28 = vld [vmem:[#allocation9 + $0x360] sm:$0xff] }
 0x6ae   : > { %2272 = vmatpush3.msra.mxu1 %v1403_v21  ;;  %v1711_v21 = vld [vmem:[#allocation9 + $0x358] sm:$0xff] }
 0x6af   : > { %2273 = vmatprep.subr.mxu1 %v1418_v22  ;;  %v1710_v22 = vld [vmem:[#allocation9 + $0x350] sm:$0xff] }
 0x6b0   : > { %2274 = vmatpush3.msra.mxu1 %v1402_v23  ;;  %v1709_v23 = vld [vmem:[#allocation9 + $0x348] sm:$0xff] }
 0x6b1   : > { %2275 = vmatprep.subr.mxu1 %v1417_v29  ;;  %v1708_v29 = vld [vmem:[#allocation9 + $0x340] sm:$0xff] }
 0x6b2   : > { %2276 = vmatpush3.msra.mxu1 %v1401_v30  ;;  %v1707_v30 = vld [vmem:[#allocation9 + $0x338] sm:$0xff] }
 0x6b3   : > { %2277 = vmatprep.subr.mxu1 %v1416_v31  ;;  %v1706_v31 = vld [vmem:[#allocation9 + $0x330] sm:$0xff] }
 0x6b4   : > { %2278 = vmatpush3.msra.mxu1 %v1400_v32 }
 0x6b5   : > { %2279 = vmatprep.subr.mxu1 %v1415_v33 }
 0x6b6   : > { %2280 = vmatpush3.msra.mxu1 %v1399_v34  ;;  %v1827_v34 = vld [vmem:[#allocation9 + $0x3f0] sm:$0xff] }
 0x6b7   : > { %2468 = vmatprep.subr.mxu1 %v1715_v20 }
 0x757   : > { %v2460_v35 = vpop.f32.mrf.mxu1 }
 0x759   : > { %v1390_v36 = vpop.f32.mrf.mxu1 }
 0x75a   : > { %1500 = vmatmul.mubr.f32.vlgmr.msra.gmra.mxu1 %v1390_v36  ;;  %v1825_v36 = vld [vmem:[#allocation9 + $0x3e0] sm:$0xff] }
 0x75b   : > { %1504 = vmatprep.mubr.f32.mxu1 %v3296_v56  ;;  %v1613_v56 = vld [vmem:[#allocation9 + $0x2d0] sm:$0xff]  ;;  %2469 = vmatpush3.msra.mxu1 %v1715_v20 }
 0x75c   : > { %2470 = vmatprep.subr.mxu1 %v1714_v26 }
 0x75d   : > { %2471 = vmatpush3.msra.mxu1 %v1714_v26 }
 0x75e   : > { %1505 = vmatmul.mubr.f32.gmra.mxu1 %v2460_v35  ;;  %2472 = vmatprep.subr.mxu1 %v1713_v27  ;;  %v1826_v35 = vld [vmem:[#allocation9 + $0x3e8] sm:$0xff] }
 0x75f   : > { %2473 = vmatpush3.msra.mxu1 %v1713_v27 }
 0x760   : > { %2474 = vmatprep.subr.mxu1 %v1712_v28 }
 0x761   : > { %2475 = vmatpush3.msra.mxu1 %v1712_v28 }
 0x762   : > { %2476 = vmatprep.subr.mxu1 %v1711_v21 }
 0x763   : > { %2477 = vmatpush3.msra.mxu1 %v1711_v21 }
 0x764   : > { %2478 = vmatprep.subr.mxu1 %v1710_v22 }
 0x765   : > { %2479 = vmatpush3.msra.mxu1 %v1710_v22 }
 0x766   : > { %2480 = vmatprep.subr.mxu1 %v1709_v23 }
 0x767   : > { %2481 = vmatpush3.msra.mxu1 %v1709_v23 }
 0x768   : > { %2482 = vmatprep.subr.mxu1 %v1708_v29 }
 0x769   : > { %2483 = vmatpush3.msra.mxu1 %v1708_v29 }
 0x76a   : > { %2484 = vmatprep.subr.mxu1 %v1707_v30 }
 0x76b   : > { %2485 = vmatpush3.msra.mxu1 %v1707_v30  ;;  %v1809_v30 = vsub.s32 2, %v3201_v5 }
 0x76c   : > { %2486 = vmatprep.subr.mxu1 %v1706_v31 }
 0x76d   : > { %2487 = vmatpush3.msra.mxu1 %v1706_v31 }
 0x81a   : > { %v2281_v37 = vpop.f32.mrf.mxu1 }
 0x81c   : > { %v2282_v39 = vpop.f32.mrf.mxu1 }
 0x81d   : > { %v2283_v42 = vadd.f32 %v2282_v39, %v2281_v37  ;;  %v1824_v37 = vld [vmem:[#allocation9 + $0x3d8] sm:$0xff]  ;;  %v1822_v39 = vld [vmem:[#allocation9 + $0x3c8] sm:$0xff] }
 0x81e   : > { %v2284_v40 = vpop.f32.mrf.mxu1 }
 0x81f   : > { %v1502_v45 = vadd.f32 %v2283_v42, %v1434_v41  ;;  %v1819_v42 = vld [vmem:[#allocation9 + $0x3b0] sm:$0xff] }
 0x820   : > { %v2285_v43 = vpop.f32.mrf.mxu1 }
 0x821   : > { %v2286_v44 = vadd.f32 %v2285_v43, %v2284_v40  ;;  %v1510_v1 = vmax.f32 %v1502_v45, 0.0  ;;  %v1821_v40 = vld [vmem:[#allocation9 + $0x3c0] sm:$0xff]  ;;  %v1705_v43 = vld [vmem:[#allocation9 + $0x328] sm:$0xff] }
 0x822   : > { %2488 = vmatprep.subr.mxu1 %v1705_v43  ;;  %v1704_v45 = vld [vmem:[#allocation9 + $0x320] sm:$0xff] }
 0x823   : > { %v1507_v46 = vadd.f32 %v2286_v44, %v1434_v41  ;;  %v1820_v41 = vld [vmem:[#allocation9 + $0x3b8] sm:$0xff]  ;;  %v1818_v44 = vld [vmem:[#allocation9 + $0x3a8] sm:$0xff]  ;;  %2489 = vmatpush3.msra.mxu1 %v1705_v43  ;;  %v1924_v43 = vld [vmem:[#allocation7 + $0x50] sm:$0xff] }
 0x824   : > { %2490 = vmatprep.subr.mxu1 %v1704_v45 }
 0x825   : > { %v3307_v47 = vmax.f32 %v1507_v46, 0.0  ;;  %v1817_v46 = vld [vmem:[#allocation9 + $0x3a0] sm:$0xff]  ;;  %2491 = vmatpush3.msra.mxu1 %v1704_v45 }
 0x827   : > { %2461 = vmatprep.subr.mxu0 %v3307_v47 }
 0x828   : > { %2462 = vmatpush3.msra.mxu0 %v3307_v47 }
 0x829   : > { %2463 = vmatprep.subr.mxu0 %v1510_v1 }
 0x82a   : > { %2464 = vmatpush3.msra.mxu0 %v1510_v1 }
 0x82b   : > { %2466 = vmatmul.mubr.msk.f32.vlgmr.msra.gmra.mxu0 %vm1317_vm10, %v3300_v59  ;;  %2291 = vmatprep.subr.mxu0 %v1618_v2  ;;  %v1596_v59 = vld [vmem:[#allocation9 + $0x248] sm:$0xff]  ;;  %v1702_v2 = vld [vmem:[#allocation9 + $0x310] sm:$0xff] }
 0x82c   : > { %1687 = vmatprep.mubr.f32.mxu0 %v1510_v1  ;;  %2292 = vmatpush3.msra.mxu0 %v1602_v3  ;;  %v1816_v1 = vld [vmem:[#allocation9 + $0x398] sm:$0xff]  ;;  %v1815_v3 = vld [vmem:[#allocation9 + $0x390] sm:$0xff] }
 0x82d   : > { %2293 = vmatprep.subr.mxu0 %v1617_v48  ;;  %v1701_v48 = vld [vmem:[#allocation9 + $0x308] sm:$0xff] }
 0x82e   : > { %2294 = vmatpush3.msra.mxu0 %v1601_v49  ;;  %v1814_v49 = vld [vmem:[#allocation9 + $0x388] sm:$0xff] }
 0x82f   : > { %2295 = vmatprep.subr.mxu0 %v1616_v50  ;;  %v1700_v50 = vld [vmem:[#allocation9 + $0x300] sm:$0xff] }
 0x830   : > { %2296 = vmatpush3.msra.mxu0 %v1600_v4  ;;  %v1813_v4 = vld [vmem:[#allocation9 + $0x380] sm:$0xff] }
 0x831   : > { %2297 = vmatprep.subr.mxu0 %v1615_v51  ;;  %v1621_v51 = vsub.s32 5, %v3201_v5 }
 0x832   : > { %2298 = vmatpush3.msra.mxu0 %v1599_v52 }
 0x833   : > { %2299 = vmatprep.subr.mxu0 %v1614_v53  ;;  %v1622_v53 = vrot.slane %v3206_v55, %v1621_v51 }
 0x834   : > { %2300 = vmatpush3.msra.mxu0 %v1598_v6 }
 0x835   : > { %2301 = vmatprep.subr.mxu0 %v1613_v56 }
 0x836   : > { %2302 = vmatpush3.msra.mxu0 %v1597_v57 }
 0x837   : > { %2303 = vmatprep.subr.mxu0 %v1612_v58 }
 0x838   : > { %2304 = vmatpush3.msra.mxu0 %v1596_v59 }
 0x839   : > { %2305 = vmatprep.subr.mxu0 %v1611_v60 }
 0x83a   : > { %2306 = vmatpush3.msra.mxu0 %v1595_v61 }
 0x83b   : > { %2307 = vmatprep.subr.mxu0 %v1610_v62 }
 0x83c   : > { %2308 = vmatpush3.msra.mxu0 %v1594_v63 }
 0x83d   : > { %2309 = vmatprep.subr.mxu0 %v1609_v0  ;;  %v1718_v0 = vsub.s32 6, %v3201_v5 }
 0x83e   : > { %2310 = vmatpush3.msra.mxu0 %v1593_v7  ;;  %v400_v7 = vld [vmem:[#allocation10 + $0x8] sm:$0xff] }
 0x83f   : > { %2311 = vmatprep.subr.mxu0 %v1608_v8  ;;  %v1719_v8 = vrot.slane %v3206_v55, %v1718_v0  ;;  %v2678_v55 = vld [vmem:[#allocation10] sm:$0xff]  ;;  %v1810_v31 = vrot.slane %v400_v7, %v1809_v30 }
 0x840   : > { %2312 = vmatpush3.msra.mxu0 %v1592_v9  ;;  %v1832_v9 = vrot.slane %v400_v7, %v3204_v54 }
 0x841   : > { %2313 = vmatprep.subr.mxu0 %v1607_v10 }
 0x842   : > { %2314 = vmatpush3.msra.mxu0 %v1591_v11 }
 0x843   : > { %2315 = vmatprep.subr.mxu0 %v1606_v12 }
 0x844   : > { %2316 = vmatpush3.msra.mxu0 %v1590_v13 }
 0x845   : > { %2317 = vmatprep.subr.mxu0 %v1605_v14  ;;  %v1913_v14 = vrot.slane %v400_v7, %v1084_v25  ;;  %v2899_v25 = vmov 1  }
 0x846   : > { %2318 = vmatpush3.msra.mxu0 %v1589_v15  ;;  %v1799_v15 = vsub.s32 7, %v3201_v5  ;;  %2628 = vset.pattern.permute.xlu1 %v2899_v25 }
 0x847   : > { %2319 = vmatprep.subr.mxu0 %v1604_v16  ;;  %2627 = vset.pattern.permute.xlu0 %v2899_v25 }
 0x848   : > { %2320 = vmatpush3.msra.mxu0 %v1588_v17  ;;  %v1800_v28 = vrot.slane %v2678_v55, %v1799_v15 }
 0x849   : > { %2321 = vmatprep.subr.mxu0 %v1603_v18 }
 0x84a   : > { %2322 = vmatpush3.msra.mxu0 %v1587_v19 }
 0x84b   : > { %2503 = vmatprep.subr.mxu0 %v1828_v24 }
 0x8eb   : > { %v2467_v32 = vpop.f32.mrf.mxu0 }
 0x8ed   : > { %v1578_v33 = vpop.f32.mrf.mxu0 }
 0x8ee   : > { %1688 = vmatmul.mubr.f32.vlgmr.msra.gmra.mxu0 %v1578_v33 }
 0x8ef   : > { %1692 = vmatprep.mubr.f32.mxu0 %v3307_v47  ;;  %2504 = vmatpush3.msra.mxu0 %v1828_v24  ;;  %v1703_v47 = vld [vmem:[#allocation9 + $0x318] sm:$0xff] }
 0x8f0   : > { %2505 = vmatprep.subr.mxu0 %v1827_v34  ;;  %2492 = vmatprep.subr.mxu1 %v1703_v47 }
 0x8f1   : > { %2506 = vmatpush3.msra.mxu0 %v1827_v34  ;;  %2493 = vmatpush3.msra.mxu1 %v1703_v47 }
 0x8f2   : > { %1693 = vmatmul.mubr.f32.gmra.mxu0 %v2467_v32  ;;  %2507 = vmatprep.subr.mxu0 %v1826_v35 }
 0x8f3   : > { %2508 = vmatpush3.msra.mxu0 %v1826_v35  ;;  %2494 = vmatprep.subr.mxu1 %v1702_v2 }
 0x8f4   : > { %2509 = vmatprep.subr.mxu0 %v1825_v36  ;;  %2495 = vmatpush3.msra.mxu1 %v1702_v2  ;;  %v1922_v2 = vld [vmem:[#allocation7 + $0x40] sm:$0xff] }
 0x8f5   : > { %2510 = vmatpush3.msra.mxu0 %v1825_v36  ;;  %2496 = vmatprep.subr.mxu1 %v1701_v48 }
 0x8f6   : > { %2511 = vmatprep.subr.mxu0 %v1824_v37  ;;  %2497 = vmatpush3.msra.mxu1 %v1701_v48 }
 0x8f7   : > { %2512 = vmatpush3.msra.mxu0 %v1824_v37  ;;  %2498 = vmatprep.subr.mxu1 %v1700_v50 }
 0x8f8   : > { %2513 = vmatprep.subr.mxu0 %v1823_v38  ;;  %2499 = vmatpush3.msra.mxu1 %v1700_v50 }
 0x8f9   : > { %2514 = vmatpush3.msra.mxu0 %v1823_v38  ;;  %v2900_v38 = vmov 0  }
 0x8fa   : > { %2515 = vmatprep.subr.mxu0 %v1822_v39 }
 0x8fb   : > { %2516 = vmatpush3.msra.mxu0 %v1822_v39 }
 0x8fc   : > { %2517 = vmatprep.subr.mxu0 %v1821_v40 }
 0x8fd   : > { %2518 = vmatpush3.msra.mxu0 %v1821_v40 }
 0x8fe   : > { %2519 = vmatprep.subr.mxu0 %v1820_v41 }
 0x8ff   : > { %2520 = vmatpush3.msra.mxu0 %v1820_v41  ;;  %v1925_v41 = vld [vmem:[#allocation7 + $0x58] sm:$0xff] }
 0x900   : > { %2521 = vmatprep.subr.mxu0 %v1819_v42 }
 0x901   : > { %2522 = vmatpush3.msra.mxu0 %v1819_v42 }
 0x902   : > { %2523 = vmatprep.subr.mxu0 %v1818_v44 }
 0x903   : > { %2524 = vmatpush3.msra.mxu0 %v1818_v44 }
 0x904   : > { %2525 = vmatprep.subr.mxu0 %v1817_v46 }
 0x905   : > { %2526 = vmatpush3.msra.mxu0 %v1817_v46 }
 0x906   : > { %2527 = vmatprep.subr.mxu0 %v1816_v1 }
 0x907   : > { %2528 = vmatpush3.msra.mxu0 %v1816_v1 }
 0x908   : > { %2529 = vmatprep.subr.mxu0 %v1815_v3 }
 0x909   : > { %2530 = vmatpush3.msra.mxu0 %v1815_v3  ;;  %v1923_v3 = vld [vmem:[#allocation7 + $0x48] sm:$0xff] }
 0x90a   : > { %2531 = vmatprep.subr.mxu0 %v1814_v49 }
 0x90b   : > { %2532 = vmatpush3.msra.mxu0 %v1814_v49 }
 0x90c   : > { %2533 = vmatprep.subr.mxu0 %v1813_v4 }
 0x90d   : > { %2534 = vmatpush3.msra.mxu0 %v1813_v4 }
 0x9ae   : > { %v2323_v52 = vpop.f32.mrf.mxu0 }
 0x9b0   : > { %v2324_v6 = vpop.f32.mrf.mxu0 }
 0x9b1   : > { %v2325_v56 = vadd.f32 %v2324_v6, %v2323_v52 }
 0x9b2   : > { %v2326_v57 = vpop.f32.mrf.mxu0 }
 0x9b3   : > { %v1690_v58 = vadd.f32 %v2325_v56, %v1622_v53 }
 0x9b4   : > { %v2327_v59 = vpop.f32.mrf.mxu0 }
 0x9b5   : > { %v1698_v60 = vmax.f32 %v1690_v58, 0.0  ;;  %v2328_v61 = vadd.f32 %v2327_v59, %v2326_v57 }
 0x9b7   : > { %v1695_v62 = vadd.f32 %v2328_v61, %v1622_v53  ;;  %2500 = vmatprep.mubr.f32.mxu1 %v1698_v60  ;;  %2535 = vmatprep.mubr.f32.mxu0 %v1698_v60  ;;  %v1926_v61 = vld [vmem:[#allocation7 + $0x60] sm:$0x1] }
 0x9b9   : > { %v1699_v63 = vmax.f32 %v1695_v62, 0.0 }
 0x9bb   : > { %2501 = vmatmul.mubr.f32.vlgmr.msra.gmra.mxu1 %v1699_v63  ;;  %2536 = vmatmul.mubr.f32.vlgmr.msra.gmra.mxu0 %v1699_v63 }
 0xa7b   : > { %v2502_v10 = vpop.f32.mrf.mxu1  ;;  %v2537_v11 = vpop.f32.mrf.mxu0 }
 0xa7c   : > { %v1792_v12 = vadd.f32 %v2502_v10, %v1719_v8  ;;  %v1905_v13 = vadd.f32 %v2537_v11, %v1832_v9 }
 0xa7d   : > { %v1786_v16 = vpop.f32.mrf.mxu1  ;;  %v1899_v17 = vpop.f32.mrf.mxu0 }
 0xa7e   : > { %v1909_v18 = vmax.f32 %v1905_v13, 0.0  ;;  %v1787_v19 = vadd.f32 %v1786_v16, %v1719_v8  ;;  %v1900_v20 = vadd.f32 %v1899_v17, %v1832_v9  ;;  %v1796_v24 = vmax.f32 %v1792_v12, 0.0 }
 0xa80   : > { %v1908_v26 = vmax.f32 %v1900_v20, 0.0  ;;  %v1915_v27 = vmul.f32 %v1913_v14, %v1909_v18  ;;  %v1795_v21 = vmax.f32 %v1787_v19, 0.0  ;;  %v1802_v23 = vmul.f32 %v1800_v28, %v1796_v24 }
 0xa82   : > { %1918 = vadd.xlane.f32.xlu1 %v1915_v27  ;;  %v1914_v22 = vmul.f32 %v1913_v14, %v1908_v26  ;;  %v1801_v29 = vmul.f32 %v1800_v28, %v1795_v21 }
 0xa84   : > { %1916 = vadd.xlane.f32.xlu0 %v1914_v22 }
 0xa86   : > { %1805 = vadd.xlane.f32.xlu1 %v1802_v23 }
 0xa88   : > { %1803 = vadd.xlane.f32.xlu0 %v1801_v29 }
 0xb0b   : > { %v1919_v32 = vpop.xlane.xlu1 %1918 }
 0xb0c   : > { %v1921_v33 = vadd.f32 %v1919_v32, %v1810_v31 }
 0xb0d   : > { %v1917_v34 = vpop.xlane.xlu0 %1916 }
 0xb0e   : > { %v1920_v35 = vadd.f32 %v1917_v34, %v1810_v31  ;;  %1953 = vperm.xlu1 %2628, %v1921_v33  }
 0xb0f   : > { %v1806_v39 = vpop.xlane.xlu1 %1805 }
 0xb10   : > { %1948 = vperm.xlu0 %2627, %v1920_v35   ;;  %v1812_v40 = vadd.f32 %v1810_v31, %v1806_v39 }
 0xb11   : > { %v1804_v36 = vpop.xlane.xlu0 %1803 }
 0xb12   : > { %v1811_v37 = vadd.f32 %v1810_v31, %v1804_v36  ;;  %2629 = vset.pattern.permute.xlu1 %v2900_v38 }
 0xb14   : > { %1929 = vperm.xlu1 %2629, %v1811_v37  }
 0xb18   : > { %1934 = vperm.xlu1 %2629, %v1812_v40  }
 0xb89   : > { %v1954_v42 = vpop.permute.xlu1 %1953 }
 0xb8a   : > { %v1957_v5 = vadd.f32 %v1954_v42, %v1925_v41 }
 0xb8b   : > { %v1949_v44 = vpop.permute.xlu0 %1948 }
 0xb8c   : > { %v1956_v45 = vadd.f32 %v1949_v44, %v1924_v43 }
 0xb8e   : > { %v1958_v46 = vmax.f32 %v1956_v45, %v1957_v5 }
 0xb8f   : > { %v1930_v47 = vpop.permute.xlu1 %1929 }
 0xb90   : > { %v1959_v1 = vrot.slane %v1958_v46, 4  ;;  %v1937_v4 = vmul.f32 %v1930_v47, %v1922_v2 }
 0xb92   : > { %v1960_v48 = vmax.f32 %v1958_v46, %v1959_v1 }
 0xb93   : > { %v1935_v49 = vpop.permute.xlu1 %1934 }
 0xb94   : > { %v1961_v50 = vrot.slane %v1960_v48, 2  ;;  %v1938_v51 = vmul.f32 %v1935_v49, %v1923_v3 }
 0xb96   : > { %v1962_v52 = vmax.f32 %v1960_v48, %v1961_v50  ;;  %v1939_v53 = vadd.f32 %v1938_v51, %v1937_v4 }
 0xb98   : > { %v1940_v6 = vrot.slane %v1939_v53, 4  ;;  %v1963_v56 = vrot.slane %v1962_v52, 1 }
 0xb9a   : > { %v1941_v57 = vadd.f32 %v1940_v6, %v1939_v53  ;;  %v1964_v59 = vmax.f32 %v1962_v52, %v1963_v56 }
 0xb9c   : > { %v1942_v58 = vrot.slane %v1941_v57, 2  ;;  %v1965_v63 = vmax.f32 %v1964_v59, %v1926_v61 }
 0xb9e   : > { %v1943_v60 = vadd.f32 %v1942_v58, %v1941_v57 }
 0xba0   : > { %v1944_v62 = vrot.slane %v1943_v60, 1 }
 0xba2   : > { %v1945_v0 = vadd.f32 %v1944_v62, %v1943_v60 }
 0xba4   : > { %v1966_v7 = vadd.f32 %v1965_v63, %v1945_v0 }
 0xba6   : > { %v1970_v8 = vrot.slane %v1966_v7, %v3204_v54 }
 0xba8   : > { %1971 = vst [vmem:[%s387_s24] sm:$0xff] %v1970_v8 }
 0xba9 PF: > { %p21_p6 = scmp.ge.s32.totalorder %s2980_s7, 6   ;;  %s3382_s21 = smov %s2879_s22 }
 0xbaa   : > { %s3383_s22 = smov %s2883_s23  ;;  %s3384_s23 = smov %s3003_s15 }
 0xbab   : > { %s3385_s24 = smov %s2980_s7  ;;  %23 = sbr.rel (!%p21_p6) target bundleno = 11 (0xb), region = 120 }
 0xbb0   :  { %1991 = vsyncpa [#allocation3], 1 }
 0xbb1   :  { %1993 = vsyncpa [#allocation3 + $0x1], 1 }
 0xbb2   :  { %1994 = vsyncpa [#allocation5], 1 }
 0xbb3   :  { %1996 = vsyncpa [#allocation5 + $0x1], 1 }
 0xbb4   :  { %1997 = vsyncpa [#allocation8], 1 }
 0xbb5   :  { %1998 = vsyncpa [#allocation11], 1 }

</bundles_post_ra>
